<compile_context>
chip_gen: v7x
topology: tpu7x:2x2x1
jax: 0.10.0
libtpu: 0.0.40
codegen_flags: <defaults>
</compile_context>

<pallas_src>
import jax
import jax.numpy as jnp
from jax import lax
from jax.experimental import pallas as pl
from jax.experimental.pallas import tpu as pltpu

K = 5          # depthwise kernel size
PAD = 2        # padding = 2 * dilation, dilation = 1
EPS = 1e-5     # BatchNorm eps (PyTorch default)


def _make_kernel(Cin, Cout, H, W):
    """Build the fused kernel closure for fixed (Cin, Cout, H, W)."""
    HW = H * W
    halo = PAD * W + PAD                         # max |flat shift| of any tap
    base = max(128, ((halo + 127) // 128) * 128)  # lane-aligned zero margin >= halo
    lpad = base + HW + base                      # padded flat scratch length

    def kernel(x_ref, dwv_ref, b1_ref, pw_ref, b2_ref, mask_ref, out_ref,
               xpad_ref):
        # x_ref:   (1, Cin, H*W)  VMEM  unpadded input, flat spatial on lanes
        # dwv_ref: (Cin, 25)      VMEM  BN1-folded depthwise taps (kh-major)
        # b1_ref:  (Cin, 1)       VMEM  BN1 bias column
        # pw_ref:  (Cout, Cin)    VMEM  BN2-folded pointwise weights
        # b2_ref:  (Cout, 1)      VMEM  BN2 bias column
        # mask_ref:(K, H*W)       VMEM  per-kw W-boundary masks (0/1)
        # out_ref: (1, Cout, H*W) VMEM
        # xpad_ref:(Cin, lpad)    VMEM scratch: zero margins + image interior

        # ---- 1) build the zero-padded flat image in VMEM scratch ----
        # (zero every step: with "parallel" megacore sharding, step 0 may not
        #  run on every core, so no pl.when gating of the init)
        xpad_ref[...] = jnp.zeros_like(xpad_ref)
        xpad_ref[:, pl.ds(base, HW)] = x_ref[0]          # lane-aligned store

        # ---- 2) depthwise 5x5 (+ folded BN1 scale), all Cin channels at once ----
        # H halo: out-of-range rows land in the zero margins of the scratch.
        # W halo: row-wrap contributions are removed by the per-kw lane mask.
        y = jnp.zeros((Cin, HW), jnp.float32)
        for kw in range(K):
            t = jnp.zeros((Cin, HW), jnp.float32)
            for kh in range(K):
                start = base + (kh - PAD) * W + (kw - PAD)   # static offset
                win = xpad_ref[:, pl.ds(start, HW)]          # (Cin, HW) vld window
                col = dwv_ref[:, pl.ds(kh * K + kw, 1)]      # (Cin, 1) tap weights
                t = t + win * col
            y = y + t * mask_ref[pl.ds(kw, 1), :]            # (1, HW) mask
        y = jnp.maximum(y + b1_ref[...], 0.0)                # BN1 bias + ReLU

        # ---- 3) pointwise 1x1 (+ folded BN2 scale), fused on the VPU ----
        acc = jnp.zeros((Cout, HW), jnp.float32)
        for ci in range(Cin):
            acc = acc + pw_ref[:, pl.ds(ci, 1)] * y[ci:ci + 1, :]
        out = jnp.maximum(acc + b2_ref[...], 0.0)            # BN2 bias + ReLU
        out_ref[0] = out.astype(out_ref.dtype)

    return kernel, lpad


def dsconv5x5(x_nchw, dw_w, bn1_scale, bn1_bias, pw_w, bn2_scale, bn2_bias):
    """Fused DSConv5x5 forward (eval-mode BN).

    x_nchw:    (B, Cin, H, W) float32
    dw_w:      (Cin, 5, 5)    depthwise weights (torch (Cin,1,5,5) squeezed)
    bn1_*:     (Cin,)         folded BN1 scale / bias
    pw_w:      (Cout, Cin)    pointwise weights (torch (Cout,Cin,1,1) squeezed)
    bn2_*:     (Cout,)        folded BN2 scale / bias
    returns    (B, Cout, H, W) float32
    """
    B, Cin, H, W = x_nchw.shape
    Cout = pw_w.shape[0]
    HW = H * W

    # Fold BN scales into the conv weights (free algebraic fold); biases stay adds.
    dw_folded = (dw_w.astype(jnp.float32) * bn1_scale.astype(jnp.float32)[:, None, None]
                 ).reshape(Cin, K * K)
    pw_folded = pw_w.astype(jnp.float32) * bn2_scale.astype(jnp.float32)[:, None]
    b1 = bn1_bias.astype(jnp.float32).reshape(Cin, 1)
    b2 = bn2_bias.astype(jnp.float32).reshape(Cout, 1)

    # Per-kw W-boundary masks for the flattened-spatial layout.
    widx = jnp.arange(HW, dtype=jnp.int32) % W
    masks = jnp.stack(
        [((widx + (kw - PAD) >= 0) & (widx + (kw - PAD) < W)).astype(jnp.float32)
         for kw in range(K)], axis=0)                            # (K, HW)

    # Free metadata reshape of contiguous NCHW -> (B, C, H*W).
    x_flat = x_nchw.reshape(B, Cin, HW)

    kernel, lpad = _make_kernel(Cin, Cout, H, W)

    flops = 2 * B * HW * Cin * (K * K + Cout)
    bytes_accessed = 4 * (B * Cin * HW + B * Cout * HW
                          + dw_folded.size + pw_folded.size
                          + b1.size + b2.size + masks.size)
    cost = pl.CostEstimate(flops=flops, transcendentals=0,
                           bytes_accessed=bytes_accessed)

    def const_spec(shape):
        return pl.BlockSpec(shape, lambda b: (0, 0))

    out_flat = pl.pallas_call(
        kernel,
        out_shape=jax.ShapeDtypeStruct((B, Cout, HW), jnp.float32),
        grid_spec=pltpu.PrefetchScalarGridSpec(
            num_scalar_prefetch=0,
            grid=(B,),
            in_specs=[
                pl.BlockSpec((1, Cin, HW), lambda b: (b, 0, 0)),   # image
                const_spec((Cin, K * K)),                          # dw taps
                const_spec((Cin, 1)),                              # bn1 bias
                const_spec((Cout, Cin)),                           # pw weights
                const_spec((Cout, 1)),                             # bn2 bias
                const_spec((K, HW)),                               # W masks
            ],
            out_specs=pl.BlockSpec((1, Cout, HW), lambda b: (b, 0, 0)),
            scratch_shapes=[pltpu.VMEM((Cin, lpad), jnp.float32)],
        ),
        compiler_params=pltpu.CompilerParams(
            dimension_semantics=("parallel",),
        ),
        cost_estimate=cost,
    )(x_flat, dw_folded, b1, pw_folded, b2, masks)

    return out_flat.reshape(B, Cout, H, W)


def _fold_bn(gamma, beta, mean, var, eps=EPS):
    scale = gamma / jnp.sqrt(var + eps)
    bias = beta - mean * scale
    return scale, bias


def _reference(x_nchw, dw_w, s1, b1, pw_w, s2, b2):
    """Pure-JAX reference (eval-mode BN), NCHW in / NCHW out."""
    B, Cin, H, W = x_nchw.shape
    Cout = pw_w.shape[0]
    dw = dw_w.reshape(Cin, 1, K, K)                   # (O=Cin, I/g=1, K, K)
    y = lax.conv_general_dilated(
        x_nchw, dw, window_strides=(1, 1), padding=((PAD, PAD), (PAD, PAD)),
        dimension_numbers=("NCHW", "OIHW", "NCHW"), feature_group_count=Cin)
    y = jnp.maximum(y * s1.reshape(1, Cin, 1, 1) + b1.reshape(1, Cin, 1, 1), 0.0)
    pw = pw_w.reshape(Cout, Cin, 1, 1)
    z = lax.conv_general_dilated(
        y, pw, window_strides=(1, 1), padding=((0, 0), (0, 0)),
        dimension_numbers=("NCHW", "OIHW", "NCHW"))
    z = jnp.maximum(z * s2.reshape(1, Cout, 1, 1) + b2.reshape(1, Cout, 1, 1), 0.0)
    return z


if __name__ == "__main__":
    key = jax.random.PRNGKey(0)
    B, Cin, H, W = 2, 4, 16, 16
    Cout = 8

    ks = jax.random.split(key, 10)
    x = jax.random.normal(ks[0], (B, Cin, H, W), jnp.float32)

    # Depthwise conv weights: torch shape (Cin, 1, 5, 5) -> kernel layout (Cin, 5, 5)
    dw_torch = jax.random.normal(ks[1], (Cin, 1, K, K), jnp.float32) * 0.2
    dw_w = dw_torch[:, 0]                                            # (Cin,5,5)

    # BN1 parameters (eval-mode folding)
    g1 = 1.0 + 0.1 * jax.random.normal(ks[2], (Cin,), jnp.float32)
    be1 = 0.1 * jax.random.normal(ks[3], (Cin,), jnp.float32)
    m1 = 0.1 * jax.random.normal(ks[4], (Cin,), jnp.float32)
    v1 = 1.0 + 0.1 * jax.nn.softplus(jax.random.normal(ks[5], (Cin,), jnp.float32))
    s1, b1 = _fold_bn(g1, be1, m1, v1)

    # Pointwise conv weights: torch shape (Cout, Cin, 1, 1) -> (Cout, Cin)
    pw_torch = jax.random.normal(ks[6], (Cout, Cin, 1, 1), jnp.float32) * 0.3
    pw_w = pw_torch[:, :, 0, 0]                                      # (Cout, Cin)

    # BN2 parameters
    g2 = 1.0 + 0.1 * jax.random.normal(ks[7], (Cout,), jnp.float32)
    be2 = 0.1 * jax.random.normal(ks[8], (Cout,), jnp.float32)
    m2 = 0.1 * jax.random.normal(ks[9], (Cout,), jnp.float32)
    v2 = jnp.ones((Cout,), jnp.float32)
    s2, b2 = _fold_bn(g2, be2, m2, v2)

    out = dsconv5x5(x, dw_w, s1, b1, pw_w, s2, b2)
    out = jax.block_until_ready(out)

    ref = _reference(x, dw_w, s1, b1, pw_w, s2, b2)
    assert out.shape == (B, Cout, H, W)
    assert jnp.allclose(out, ref, atol=1e-4, rtol=1e-4), "mismatch vs reference"

    print("KERNEL_OK")
</pallas_src>

<mosaic_0001>
module attributes {stable_mosaic.version = 11 : i64} {
  func.func @kernel(%arg0: i32, %arg1: memref<1x4x256xf32, #tpu.memory_space<vmem>>, %arg2: memref<4x25xf32, #tpu.memory_space<vmem>>, %arg3: memref<4x1xf32, #tpu.memory_space<vmem>>, %arg4: memref<8x4xf32, #tpu.memory_space<vmem>>, %arg5: memref<8x1xf32, #tpu.memory_space<vmem>>, %arg6: memref<5x256xf32, #tpu.memory_space<vmem>>, %arg7: memref<1x8x256xf32, #tpu.memory_space<vmem>>, %arg8: memref<4x512xf32, #tpu.memory_space<vmem>>) attributes {dimension_semantics = [#tpu.dimension_semantics<parallel>], iteration_bounds = array<i64: 2>, scalar_prefetch = 0 : i64, scratch_operands = 1 : i64, tpu.core_type = #tpu.core_type<tc>, window_params = [{transform_indices = @transform_0, window_bounds = array<i64: 1, 4, 256>}, {pipeline_mode = #tpu.pipeline_mode<synchronous>, transform_indices = @transform_1, window_bounds = array<i64: 4, 25>}, {pipeline_mode = #tpu.pipeline_mode<synchronous>, transform_indices = @transform_2, window_bounds = array<i64: 4, 1>}, {pipeline_mode = #tpu.pipeline_mode<synchronous>, transform_indices = @transform_3, window_bounds = array<i64: 8, 4>}, {pipeline_mode = #tpu.pipeline_mode<synchronous>, transform_indices = @transform_4, window_bounds = array<i64: 8, 1>}, {pipeline_mode = #tpu.pipeline_mode<synchronous>, transform_indices = @transform_5, window_bounds = array<i64: 5, 256>}, {transform_indices = @transform_6, window_bounds = array<i64: 1, 8, 256>}]} {
    %cst = arith.constant 0.000000e+00 : f32
    %0 = vector.broadcast %cst : f32 to vector<4x512xf32>
    %c0 = arith.constant 0 : index
    %c0_0 = arith.constant 0 : index
    %1 = vector.load %arg8[%c0, %c0_0] : memref<4x512xf32, #tpu.memory_space<vmem>>, vector<4x512xf32>
    tpu.vector_store %arg8[%c0, %c0_0], %0 {strides = array<i32>} : memref<4x512xf32, #tpu.memory_space<vmem>>, vector<4x512xf32>,
    %c0_1 = arith.constant 0 : index
    %c0_2 = arith.constant 0 : index
    %c0_3 = arith.constant 0 : index
    %2 = vector.load %arg1[%c0_1, %c0_2, %c0_3] : memref<1x4x256xf32, #tpu.memory_space<vmem>>, vector<1x4x256xf32>
    %3 = vector.shape_cast %2 : vector<1x4x256xf32> to vector<4x256xf32>
    %c0_4 = arith.constant 0 : index
    %c128 = arith.constant 128 : index
    %4 = vector.load %arg8[%c0_4, %c128] : memref<4x512xf32, #tpu.memory_space<vmem>>, vector<4x256xf32>
    tpu.vector_store %arg8[%c0_4, %c128], %3 {strides = array<i32>} : memref<4x512xf32, #tpu.memory_space<vmem>>, vector<4x256xf32>,
    %cst_5 = arith.constant 0.000000e+00 : f32
    %5 = vector.broadcast %cst_5 : f32 to vector<4x256xf32>
    %cst_6 = arith.constant 0.000000e+00 : f32
    %6 = vector.broadcast %cst_6 : f32 to vector<4x256xf32>
    %c0_7 = arith.constant 0 : index
    %c94 = arith.constant 94 : index
    %7 = vector.load %arg8[%c0_7, %c94] : memref<4x512xf32, #tpu.memory_space<vmem>>, vector<4x256xf32>
    %c0_8 = arith.constant 0 : index
    %c0_9 = arith.constant 0 : index
    %8 = vector.load %arg2[%c0_8, %c0_9] : memref<4x25xf32, #tpu.memory_space<vmem>>, vector<4x1xf32>
    %9 = vector.broadcast %8 : vector<4x1xf32> to vector<4x256xf32>
    %10 = arith.mulf %7, %9 : vector<4x256xf32>
    %11 = arith.addf %6, %10 : vector<4x256xf32>
    %c0_10 = arith.constant 0 : index
    %c110 = arith.constant 110 : index
    %12 = vector.load %arg8[%c0_10, %c110] : memref<4x512xf32, #tpu.memory_space<vmem>>, vector<4x256xf32>
    %c0_11 = arith.constant 0 : index
    %c5 = arith.constant 5 : index
    %13 = vector.load %arg2[%c0_11, %c5] : memref<4x25xf32, #tpu.memory_space<vmem>>, vector<4x1xf32>
    %14 = vector.broadcast %13 : vector<4x1xf32> to vector<4x256xf32>
    %15 = arith.mulf %12, %14 : vector<4x256xf32>
    %16 = arith.addf %11, %15 : vector<4x256xf32>
    %c0_12 = arith.constant 0 : index
    %c126 = arith.constant 126 : index
    %17 = vector.load %arg8[%c0_12, %c126] : memref<4x512xf32, #tpu.memory_space<vmem>>, vector<4x256xf32>
    %c0_13 = arith.constant 0 : index
    %c10 = arith.constant 10 : index
    %18 = vector.load %arg2[%c0_13, %c10] : memref<4x25xf32, #tpu.memory_space<vmem>>, vector<4x1xf32>
    %19 = vector.broadcast %18 : vector<4x1xf32> to vector<4x256xf32>
    %20 = arith.mulf %17, %19 : vector<4x256xf32>
    %21 = arith.addf %16, %20 : vector<4x256xf32>
    %c0_14 = arith.constant 0 : index
    %c142 = arith.constant 142 : index
    %22 = vector.load %arg8[%c0_14, %c142] : memref<4x512xf32, #tpu.memory_space<vmem>>, vector<4x256xf32>
    %c0_15 = arith.constant 0 : index
    %c15 = arith.constant 15 : index
    %23 = vector.load %arg2[%c0_15, %c15] : memref<4x25xf32, #tpu.memory_space<vmem>>, vector<4x1xf32>
    %24 = vector.broadcast %23 : vector<4x1xf32> to vector<4x256xf32>
    %25 = arith.mulf %22, %24 : vector<4x256xf32>
    %26 = arith.addf %21, %25 : vector<4x256xf32>
    %c0_16 = arith.constant 0 : index
    %c158 = arith.constant 158 : index
    %27 = vector.load %arg8[%c0_16, %c158] : memref<4x512xf32, #tpu.memory_space<vmem>>, vector<4x256xf32>
    %c0_17 = arith.constant 0 : index
    %c20 = arith.constant 20 : index
    %28 = vector.load %arg2[%c0_17, %c20] : memref<4x25xf32, #tpu.memory_space<vmem>>, vector<4x1xf32>
    %29 = vector.broadcast %28 : vector<4x1xf32> to vector<4x256xf32>
    %30 = arith.mulf %27, %29 : vector<4x256xf32>
    %31 = arith.addf %26, %30 : vector<4x256xf32>
    %c0_18 = arith.constant 0 : index
    %c0_19 = arith.constant 0 : index
    %32 = vector.load %arg6[%c0_18, %c0_19] : memref<5x256xf32, #tpu.memory_space<vmem>>, vector<1x256xf32>
    %33 = vector.broadcast %32 : vector<1x256xf32> to vector<4x256xf32>
    %34 = arith.mulf %31, %33 : vector<4x256xf32>
    %35 = arith.addf %5, %34 : vector<4x256xf32>
    %cst_20 = arith.constant 0.000000e+00 : f32
    %36 = vector.broadcast %cst_20 : f32 to vector<4x256xf32>
    %c0_21 = arith.constant 0 : index
    %c95 = arith.constant 95 : index
    %37 = vector.load %arg8[%c0_21, %c95] : memref<4x512xf32, #tpu.memory_space<vmem>>, vector<4x256xf32>
    %c0_22 = arith.constant 0 : index
    %c1 = arith.constant 1 : index
    %38 = vector.load %arg2[%c0_22, %c1] : memref<4x25xf32, #tpu.memory_space<vmem>>, vector<4x1xf32>
    %39 = vector.broadcast %38 : vector<4x1xf32> to vector<4x256xf32>
    %40 = arith.mulf %37, %39 : vector<4x256xf32>
    %41 = arith.addf %36, %40 : vector<4x256xf32>
    %c0_23 = arith.constant 0 : index
    %c111 = arith.constant 111 : index
    %42 = vector.load %arg8[%c0_23, %c111] : memref<4x512xf32, #tpu.memory_space<vmem>>, vector<4x256xf32>
    %c0_24 = arith.constant 0 : index
    %c6 = arith.constant 6 : index
    %43 = vector.load %arg2[%c0_24, %c6] : memref<4x25xf32, #tpu.memory_space<vmem>>, vector<4x1xf32>
    %44 = vector.broadcast %43 : vector<4x1xf32> to vector<4x256xf32>
    %45 = arith.mulf %42, %44 : vector<4x256xf32>
    %46 = arith.addf %41, %45 : vector<4x256xf32>
    %c0_25 = arith.constant 0 : index
    %c127 = arith.constant 127 : index
    %47 = vector.load %arg8[%c0_25, %c127] : memref<4x512xf32, #tpu.memory_space<vmem>>, vector<4x256xf32>
    %c0_26 = arith.constant 0 : index
    %c11 = arith.constant 11 : index
    %48 = vector.load %arg2[%c0_26, %c11] : memref<4x25xf32, #tpu.memory_space<vmem>>, vector<4x1xf32>
    %49 = vector.broadcast %48 : vector<4x1xf32> to vector<4x256xf32>
    %50 = arith.mulf %47, %49 : vector<4x256xf32>
    %51 = arith.addf %46, %50 : vector<4x256xf32>
    %c0_27 = arith.constant 0 : index
    %c143 = arith.constant 143 : index
    %52 = vector.load %arg8[%c0_27, %c143] : memref<4x512xf32, #tpu.memory_space<vmem>>, vector<4x256xf32>
    %c0_28 = arith.constant 0 : index
    %c16 = arith.constant 16 : index
    %53 = vector.load %arg2[%c0_28, %c16] : memref<4x25xf32, #tpu.memory_space<vmem>>, vector<4x1xf32>
    %54 = vector.broadcast %53 : vector<4x1xf32> to vector<4x256xf32>
    %55 = arith.mulf %52, %54 : vector<4x256xf32>
    %56 = arith.addf %51, %55 : vector<4x256xf32>
    %c0_29 = arith.constant 0 : index
    %c159 = arith.constant 159 : index
    %57 = vector.load %arg8[%c0_29, %c159] : memref<4x512xf32, #tpu.memory_space<vmem>>, vector<4x256xf32>
    %c0_30 = arith.constant 0 : index
    %c21 = arith.constant 21 : index
    %58 = vector.load %arg2[%c0_30, %c21] : memref<4x25xf32, #tpu.memory_space<vmem>>, vector<4x1xf32>
    %59 = vector.broadcast %58 : vector<4x1xf32> to vector<4x256xf32>
    %60 = arith.mulf %57, %59 : vector<4x256xf32>
    %61 = arith.addf %56, %60 : vector<4x256xf32>
    %c1_31 = arith.constant 1 : index
    %c0_32 = arith.constant 0 : index
    %62 = vector.load %arg6[%c1_31, %c0_32] : memref<5x256xf32, #tpu.memory_space<vmem>>, vector<1x256xf32>
    %63 = vector.broadcast %62 : vector<1x256xf32> to vector<4x256xf32>
    %64 = arith.mulf %61, %63 : vector<4x256xf32>
    %65 = arith.addf %35, %64 : vector<4x256xf32>
    %cst_33 = arith.constant 0.000000e+00 : f32
    %66 = vector.broadcast %cst_33 : f32 to vector<4x256xf32>
    %c0_34 = arith.constant 0 : index
    %c96 = arith.constant 96 : index
    %67 = vector.load %arg8[%c0_34, %c96] : memref<4x512xf32, #tpu.memory_space<vmem>>, vector<4x256xf32>
    %c0_35 = arith.constant 0 : index
    %c2 = arith.constant 2 : index
    %68 = vector.load %arg2[%c0_35, %c2] : memref<4x25xf32, #tpu.memory_space<vmem>>, vector<4x1xf32>
    %69 = vector.broadcast %68 : vector<4x1xf32> to vector<4x256xf32>
    %70 = arith.mulf %67, %69 : vector<4x256xf32>
    %71 = arith.addf %66, %70 : vector<4x256xf32>
    %c0_36 = arith.constant 0 : index
    %c112 = arith.constant 112 : index
    %72 = vector.load %arg8[%c0_36, %c112] : memref<4x512xf32, #tpu.memory_space<vmem>>, vector<4x256xf32>
    %c0_37 = arith.constant 0 : index
    %c7 = arith.constant 7 : index
    %73 = vector.load %arg2[%c0_37, %c7] : memref<4x25xf32, #tpu.memory_space<vmem>>, vector<4x1xf32>
    %74 = vector.broadcast %73 : vector<4x1xf32> to vector<4x256xf32>
    %75 = arith.mulf %72, %74 : vector<4x256xf32>
    %76 = arith.addf %71, %75 : vector<4x256xf32>
    %c0_38 = arith.constant 0 : index
    %c128_39 = arith.constant 128 : index
    %77 = vector.load %arg8[%c0_38, %c128_39] : memref<4x512xf32, #tpu.memory_space<vmem>>, vector<4x256xf32>
    %c0_40 = arith.constant 0 : index
    %c12 = arith.constant 12 : index
    %78 = vector.load %arg2[%c0_40, %c12] : memref<4x25xf32, #tpu.memory_space<vmem>>, vector<4x1xf32>
    %79 = vector.broadcast %78 : vector<4x1xf32> to vector<4x256xf32>
    %80 = arith.mulf %77, %79 : vector<4x256xf32>
    %81 = arith.addf %76, %80 : vector<4x256xf32>
    %c0_41 = arith.constant 0 : index
    %c144 = arith.constant 144 : index
    %82 = vector.load %arg8[%c0_41, %c144] : memref<4x512xf32, #tpu.memory_space<vmem>>, vector<4x256xf32>
    %c0_42 = arith.constant 0 : index
    %c17 = arith.constant 17 : index
    %83 = vector.load %arg2[%c0_42, %c17] : memref<4x25xf32, #tpu.memory_space<vmem>>, vector<4x1xf32>
    %84 = vector.broadcast %83 : vector<4x1xf32> to vector<4x256xf32>
    %85 = arith.mulf %82, %84 : vector<4x256xf32>
    %86 = arith.addf %81, %85 : vector<4x256xf32>
    %c0_43 = arith.constant 0 : index
    %c160 = arith.constant 160 : index
    %87 = vector.load %arg8[%c0_43, %c160] : memref<4x512xf32, #tpu.memory_space<vmem>>, vector<4x256xf32>
    %c0_44 = arith.constant 0 : index
    %c22 = arith.constant 22 : index
    %88 = vector.load %arg2[%c0_44, %c22] : memref<4x25xf32, #tpu.memory_space<vmem>>, vector<4x1xf32>
    %89 = vector.broadcast %88 : vector<4x1xf32> to vector<4x256xf32>
    %90 = arith.mulf %87, %89 : vector<4x256xf32>
    %91 = arith.addf %86, %90 : vector<4x256xf32>
    %c2_45 = arith.constant 2 : index
    %c0_46 = arith.constant 0 : index
    %92 = vector.load %arg6[%c2_45, %c0_46] : memref<5x256xf32, #tpu.memory_space<vmem>>, vector<1x256xf32>
    %93 = vector.broadcast %92 : vector<1x256xf32> to vector<4x256xf32>
    %94 = arith.mulf %91, %93 : vector<4x256xf32>
    %95 = arith.addf %65, %94 : vector<4x256xf32>
    %cst_47 = arith.constant 0.000000e+00 : f32
    %96 = vector.broadcast %cst_47 : f32 to vector<4x256xf32>
    %c0_48 = arith.constant 0 : index
    %c97 = arith.constant 97 : index
    %97 = vector.load %arg8[%c0_48, %c97] : memref<4x512xf32, #tpu.memory_space<vmem>>, vector<4x256xf32>
    %c0_49 = arith.constant 0 : index
    %c3 = arith.constant 3 : index
    %98 = vector.load %arg2[%c0_49, %c3] : memref<4x25xf32, #tpu.memory_space<vmem>>, vector<4x1xf32>
    %99 = vector.broadcast %98 : vector<4x1xf32> to vector<4x256xf32>
    %100 = arith.mulf %97, %99 : vector<4x256xf32>
    %101 = arith.addf %96, %100 : vector<4x256xf32>
    %c0_50 = arith.constant 0 : index
    %c113 = arith.constant 113 : index
    %102 = vector.load %arg8[%c0_50, %c113] : memref<4x512xf32, #tpu.memory_space<vmem>>, vector<4x256xf32>
    %c0_51 = arith.constant 0 : index
    %c8 = arith.constant 8 : index
    %103 = vector.load %arg2[%c0_51, %c8] : memref<4x25xf32, #tpu.memory_space<vmem>>, vector<4x1xf32>
    %104 = vector.broadcast %103 : vector<4x1xf32> to vector<4x256xf32>
    %105 = arith.mulf %102, %104 : vector<4x256xf32>
    %106 = arith.addf %101, %105 : vector<4x256xf32>
    %c0_52 = arith.constant 0 : index
    %c129 = arith.constant 129 : index
    %107 = vector.load %arg8[%c0_52, %c129] : memref<4x512xf32, #tpu.memory_space<vmem>>, vector<4x256xf32>
    %c0_53 = arith.constant 0 : index
    %c13 = arith.constant 13 : index
    %108 = vector.load %arg2[%c0_53, %c13] : memref<4x25xf32, #tpu.memory_space<vmem>>, vector<4x1xf32>
    %109 = vector.broadcast %108 : vector<4x1xf32> to vector<4x256xf32>
    %110 = arith.mulf %107, %109 : vector<4x256xf32>
    %111 = arith.addf %106, %110 : vector<4x256xf32>
    %c0_54 = arith.constant 0 : index
    %c145 = arith.constant 145 : index
    %112 = vector.load %arg8[%c0_54, %c145] : memref<4x512xf32, #tpu.memory_space<vmem>>, vector<4x256xf32>
    %c0_55 = arith.constant 0 : index
    %c18 = arith.constant 18 : index
    %113 = vector.load %arg2[%c0_55, %c18] : memref<4x25xf32, #tpu.memory_space<vmem>>, vector<4x1xf32>
    %114 = vector.broadcast %113 : vector<4x1xf32> to vector<4x256xf32>
    %115 = arith.mulf %112, %114 : vector<4x256xf32>
    %116 = arith.addf %111, %115 : vector<4x256xf32>
    %c0_56 = arith.constant 0 : index
    %c161 = arith.constant 161 : index
    %117 = vector.load %arg8[%c0_56, %c161] : memref<4x512xf32, #tpu.memory_space<vmem>>, vector<4x256xf32>
    %c0_57 = arith.constant 0 : index
    %c23 = arith.constant 23 : index
    %118 = vector.load %arg2[%c0_57, %c23] : memref<4x25xf32, #tpu.memory_space<vmem>>, vector<4x1xf32>
    %119 = vector.broadcast %118 : vector<4x1xf32> to vector<4x256xf32>
    %120 = arith.mulf %117, %119 : vector<4x256xf32>
    %121 = arith.addf %116, %120 : vector<4x256xf32>
    %c3_58 = arith.constant 3 : index
    %c0_59 = arith.constant 0 : index
    %122 = vector.load %arg6[%c3_58, %c0_59] : memref<5x256xf32, #tpu.memory_space<vmem>>, vector<1x256xf32>
    %123 = vector.broadcast %122 : vector<1x256xf32> to vector<4x256xf32>
    %124 = arith.mulf %121, %123 : vector<4x256xf32>
    %125 = arith.addf %95, %124 : vector<4x256xf32>
    %cst_60 = arith.constant 0.000000e+00 : f32
    %126 = vector.broadcast %cst_60 : f32 to vector<4x256xf32>
    %c0_61 = arith.constant 0 : index
    %c98 = arith.constant 98 : index
    %127 = vector.load %arg8[%c0_61, %c98] : memref<4x512xf32, #tpu.memory_space<vmem>>, vector<4x256xf32>
    %c0_62 = arith.constant 0 : index
    %c4 = arith.constant 4 : index
    %128 = vector.load %arg2[%c0_62, %c4] : memref<4x25xf32, #tpu.memory_space<vmem>>, vector<4x1xf32>
    %129 = vector.broadcast %128 : vector<4x1xf32> to vector<4x256xf32>
    %130 = arith.mulf %127, %129 : vector<4x256xf32>
    %131 = arith.addf %126, %130 : vector<4x256xf32>
    %c0_63 = arith.constant 0 : index
    %c114 = arith.constant 114 : index
    %132 = vector.load %arg8[%c0_63, %c114] : memref<4x512xf32, #tpu.memory_space<vmem>>, vector<4x256xf32>
    %c0_64 = arith.constant 0 : index
    %c9 = arith.constant 9 : index
    %133 = vector.load %arg2[%c0_64, %c9] : memref<4x25xf32, #tpu.memory_space<vmem>>, vector<4x1xf32>
    %134 = vector.broadcast %133 : vector<4x1xf32> to vector<4x256xf32>
    %135 = arith.mulf %132, %134 : vector<4x256xf32>
    %136 = arith.addf %131, %135 : vector<4x256xf32>
    %c0_65 = arith.constant 0 : index
    %c130 = arith.constant 130 : index
    %137 = vector.load %arg8[%c0_65, %c130] : memref<4x512xf32, #tpu.memory_space<vmem>>, vector<4x256xf32>
    %c0_66 = arith.constant 0 : index
    %c14 = arith.constant 14 : index
    %138 = vector.load %arg2[%c0_66, %c14] : memref<4x25xf32, #tpu.memory_space<vmem>>, vector<4x1xf32>
    %139 = vector.broadcast %138 : vector<4x1xf32> to vector<4x256xf32>
    %140 = arith.mulf %137, %139 : vector<4x256xf32>
    %141 = arith.addf %136, %140 : vector<4x256xf32>
    %c0_67 = arith.constant 0 : index
    %c146 = arith.constant 146 : index
    %142 = vector.load %arg8[%c0_67, %c146] : memref<4x512xf32, #tpu.memory_space<vmem>>, vector<4x256xf32>
    %c0_68 = arith.constant 0 : index
    %c19 = arith.constant 19 : index
    %143 = vector.load %arg2[%c0_68, %c19] : memref<4x25xf32, #tpu.memory_space<vmem>>, vector<4x1xf32>
    %144 = vector.broadcast %143 : vector<4x1xf32> to vector<4x256xf32>
    %145 = arith.mulf %142, %144 : vector<4x256xf32>
    %146 = arith.addf %141, %145 : vector<4x256xf32>
    %c0_69 = arith.constant 0 : index
    %c162 = arith.constant 162 : index
    %147 = vector.load %arg8[%c0_69, %c162] : memref<4x512xf32, #tpu.memory_space<vmem>>, vector<4x256xf32>
    %c0_70 = arith.constant 0 : index
    %c24 = arith.constant 24 : index
    %148 = vector.load %arg2[%c0_70, %c24] : memref<4x25xf32, #tpu.memory_space<vmem>>, vector<4x1xf32>
    %149 = vector.broadcast %148 : vector<4x1xf32> to vector<4x256xf32>
    %150 = arith.mulf %147, %149 : vector<4x256xf32>
    %151 = arith.addf %146, %150 : vector<4x256xf32>
    %c4_71 = arith.constant 4 : index
    %c0_72 = arith.constant 0 : index
    %152 = vector.load %arg6[%c4_71, %c0_72] : memref<5x256xf32, #tpu.memory_space<vmem>>, vector<1x256xf32>
    %153 = vector.broadcast %152 : vector<1x256xf32> to vector<4x256xf32>
    %154 = arith.mulf %151, %153 : vector<4x256xf32>
    %155 = arith.addf %125, %154 : vector<4x256xf32>
    %c0_73 = arith.constant 0 : index
    %c0_74 = arith.constant 0 : index
    %156 = vector.load %arg3[%c0_73, %c0_74] : memref<4x1xf32, #tpu.memory_space<vmem>>, vector<4x1xf32>
    %157 = vector.broadcast %156 : vector<4x1xf32> to vector<4x256xf32>
    %158 = arith.addf %155, %157 : vector<4x256xf32>
    %cst_75 = arith.constant 0.000000e+00 : f32
    %159 = vector.broadcast %cst_75 : f32 to vector<4x256xf32>
    %160 = arith.maximumf %158, %159 : vector<4x256xf32>
    %cst_76 = arith.constant 0.000000e+00 : f32
    %161 = vector.broadcast %cst_76 : f32 to vector<8x256xf32>
    %c0_77 = arith.constant 0 : index
    %c0_78 = arith.constant 0 : index
    %162 = vector.load %arg4[%c0_77, %c0_78] : memref<8x4xf32, #tpu.memory_space<vmem>>, vector<8x1xf32>
    %163 = vector.extract_strided_slice %160 {offsets = [0, 0], sizes = [1, 256], strides = [1, 1]} : vector<4x256xf32> to vector<1x256xf32>
    %164 = vector.broadcast %162 : vector<8x1xf32> to vector<8x256xf32>
    %165 = vector.broadcast %163 : vector<1x256xf32> to vector<8x256xf32>
    %166 = arith.mulf %164, %165 : vector<8x256xf32>
    %167 = arith.addf %161, %166 : vector<8x256xf32>
    %c0_79 = arith.constant 0 : index
    %c1_80 = arith.constant 1 : index
    %168 = vector.load %arg4[%c0_79, %c1_80] : memref<8x4xf32, #tpu.memory_space<vmem>>, vector<8x1xf32>
    %169 = vector.extract_strided_slice %160 {offsets = [1, 0], sizes = [1, 256], strides = [1, 1]} : vector<4x256xf32> to vector<1x256xf32>
    %170 = vector.broadcast %168 : vector<8x1xf32> to vector<8x256xf32>
    %171 = vector.broadcast %169 : vector<1x256xf32> to vector<8x256xf32>
    %172 = arith.mulf %170, %171 : vector<8x256xf32>
    %173 = arith.addf %167, %172 : vector<8x256xf32>
    %c0_81 = arith.constant 0 : index
    %c2_82 = arith.constant 2 : index
    %174 = vector.load %arg4[%c0_81, %c2_82] : memref<8x4xf32, #tpu.memory_space<vmem>>, vector<8x1xf32>
    %175 = vector.extract_strided_slice %160 {offsets = [2, 0], sizes = [1, 256], strides = [1, 1]} : vector<4x256xf32> to vector<1x256xf32>
    %176 = vector.broadcast %174 : vector<8x1xf32> to vector<8x256xf32>
    %177 = vector.broadcast %175 : vector<1x256xf32> to vector<8x256xf32>
    %178 = arith.mulf %176, %177 : vector<8x256xf32>
    %179 = arith.addf %173, %178 : vector<8x256xf32>
    %c0_83 = arith.constant 0 : index
    %c3_84 = arith.constant 3 : index
    %180 = vector.load %arg4[%c0_83, %c3_84] : memref<8x4xf32, #tpu.memory_space<vmem>>, vector<8x1xf32>
    %181 = vector.extract_strided_slice %160 {offsets = [3, 0], sizes = [1, 256], strides = [1, 1]} : vector<4x256xf32> to vector<1x256xf32>
    %182 = vector.broadcast %180 : vector<8x1xf32> to vector<8x256xf32>
    %183 = vector.broadcast %181 : vector<1x256xf32> to vector<8x256xf32>
    %184 = arith.mulf %182, %183 : vector<8x256xf32>
    %185 = arith.addf %179, %184 : vector<8x256xf32>
    %c0_85 = arith.constant 0 : index
    %c0_86 = arith.constant 0 : index
    %186 = vector.load %arg5[%c0_85, %c0_86] : memref<8x1xf32, #tpu.memory_space<vmem>>, vector<8x1xf32>
    %187 = vector.broadcast %186 : vector<8x1xf32> to vector<8x256xf32>
    %188 = arith.addf %185, %187 : vector<8x256xf32>
    %cst_87 = arith.constant 0.000000e+00 : f32
    %189 = vector.broadcast %cst_87 : f32 to vector<8x256xf32>
    %190 = arith.maximumf %188, %189 : vector<8x256xf32>
    %c0_88 = arith.constant 0 : index
    %c0_89 = arith.constant 0 : index
    %c0_90 = arith.constant 0 : index
    %191 = vector.load %arg7[%c0_88, %c0_89, %c0_90] : memref<1x8x256xf32, #tpu.memory_space<vmem>>, vector<1x8x256xf32>
    %192 = vector.shape_cast %191 : vector<1x8x256xf32> to vector<8x256xf32>
    %193 = vector.shape_cast %190 : vector<8x256xf32> to vector<1x8x256xf32>
    tpu.vector_store %arg7[%c0_88, %c0_89, %c0_90], %193 {strides = array<i32>} : memref<1x8x256xf32, #tpu.memory_space<vmem>>, vector<1x8x256xf32>,
    return
  }
  func.func @transform_0(%arg0: i32) -> (i32, i32, i32) {
    %c0_i32 = arith.constant 0 : i32
    %c0_i32_0 = arith.constant 0 : i32
    %c0_i32_1 = arith.constant 0 : i32
    return %arg0, %c0_i32, %c0_i32_0 : i32, i32, i32
  }
  func.func @transform_1(%arg0: i32) -> (i32, i32) {
    %c0_i32 = arith.constant 0 : i32
    %c0_i32_0 = arith.constant 0 : i32
    %c0_i32_1 = arith.constant 0 : i32
    return %c0_i32, %c0_i32_0 : i32, i32
  }
  func.func @transform_2(%arg0: i32) -> (i32, i32) {
    %c0_i32 = arith.constant 0 : i32
    %c0_i32_0 = arith.constant 0 : i32
    %c0_i32_1 = arith.constant 0 : i32
    return %c0_i32, %c0_i32_0 : i32, i32
  }
  func.func @transform_3(%arg0: i32) -> (i32, i32) {
    %c0_i32 = arith.constant 0 : i32
    %c0_i32_0 = arith.constant 0 : i32
    %c0_i32_1 = arith.constant 0 : i32
    return %c0_i32, %c0_i32_0 : i32, i32
  }
  func.func @transform_4(%arg0: i32) -> (i32, i32) {
    %c0_i32 = arith.constant 0 : i32
    %c0_i32_0 = arith.constant 0 : i32
    %c0_i32_1 = arith.constant 0 : i32
    return %c0_i32, %c0_i32_0 : i32, i32
  }
  func.func @transform_5(%arg0: i32) -> (i32, i32) {
    %c0_i32 = arith.constant 0 : i32
    %c0_i32_0 = arith.constant 0 : i32
    %c0_i32_1 = arith.constant 0 : i32
    return %c0_i32, %c0_i32_0 : i32, i32
  }
  func.func @transform_6(%arg0: i32) -> (i32, i32, i32) {
    %c0_i32 = arith.constant 0 : i32
    %c0_i32_0 = arith.constant 0 : i32
    %c0_i32_1 = arith.constant 0 : i32
    return %arg0, %c0_i32, %c0_i32_0 : i32, i32, i32
  }
}

</mosaic_0001>

<bundles_post_ra>
// kernel: tpu_custom_call.1
= control target key start
LH: loop header
LB: loop body
LE: loop exit
PB: predicated region body
PF: predicated region fallthrough
CT: control target
= control target key end

     0   :  { %11 = vsyncpa [#allocation4], 0  ;;  %s2113_s0 = inlined_call_operand.vmem [shape: f32[2,4,256], index: 0, kind: input, shape index: {}]   ;;  %s2114_s1 = inlined_call_operand.hbm [shape: f32[4,25], index: 1, kind: input, shape index: {}]   ;;  %s2115_s2 = inlined_call_operand.vmem [shape: f32[4,1], index: 2, kind: input, shape index: {}]   ;;  %s2116_s3 = inlined_call_operand.vmem [shape: f32[8,4], index: 3, kind: input, shape index: {}]   ;;  %s2117_s4 = inlined_call_operand.vmem [shape: f32[8,1], index: 4, kind: input, shape index: {}]   ;;  %s2118_s5 = inlined_call_operand.vmem [shape: f32[5,256], index: 5, kind: input, shape index: {}]   ;;  %s2119_s6 = inlined_call_operand.hbm [shape: f32[2,8,256], index: 6, kind: output, shape index: {}]  }
   0x1   :  { %12 = vsyncpa [#allocation5], 0 }
   0x2   :  { %14 = vsyncpa [#allocation5 + $0x1], 0  ;;  %s1662_s21 = smov 0   ;;  %s1664_s22 = smov 0  }
   0x3   :  { %s1666_s23 = smov 0   ;;  %s1668_s24 = smov 0  }
   0x4 LB: > { %s1683_s25 = sadd.s32 4294967295, %s1583_s24   ;;  %s1348_s26 = sadd.s32 4294967294, %s1583_s24   ;;  %s1583_s24 = sphi %s1668_s24, %s2135_s24   ;;  %s1579_s23 = sphi %s1666_s23, %s2134_s23   ;;  %s1575_s22 = sphi %s1664_s22, %s2133_s22   ;;  %s1571_s21 = sphi %s1662_s21, %s2132_s21  }
   0x5   : > { %s1687_s27 = sadd.s32 1, %s1583_s24   ;;  %s158_s28 = sadd.s32 1, %s1579_s23 }
   0x6   : > { %s155_s29 = ssub.s32 %s1583_s24, %s1687_s27  ;;  %p168_p0 = scmp.ne.s32.totalorder %s1579_s23, %s1575_s22 }
   0x7   : > { %p156_p1 = scmp.eq.s32.totalorder %s155_s29, 0  ;;  %p169_p2 = scmp.eq.s32.totalorder %s1683_s25, 1 }
   0x8   : > { %p174_p3 = scmp.ne.s32.totalorder %s1575_s22, %s1571_s21  ;;  %p175_p4 = scmp.eq.s32.totalorder %s1348_s26, 1 }
   0x9   : > { %s1698_s30 = scalar_select %p156_p1, %s1579_s23, %s158_s28  }
   0xa   : > { %p1700_p5 = por %p169_p2, %p168_p0  ;;  %p1704_p6 = por %p175_p4, %p174_p3 }
   0xb   : > { %p1349_p7 = scmp.ge.s32.totalorder %s1583_s24, 1  ;;  %p182_p8 = scmp.lt.s32.totalorder %s1583_s24, 3 }
   0xc   : > { %s2123_s7 = scalar_select %p1700_p5, 1, 0 }
   0xd   : > { %s2124_s8 = scalar_select %p1704_p6, 1, 0 }
   0xe   : > { %p2120_p9 = scmp.eq.s32.totalorder %s1683_s25, 0  ;;  %p1711_p10 = pnand %p1349_p7, %p182_p8 }
   0xf   : > { %s1585_s10 = smov [#allocation3]   ;;  %s1489_s15 = scalar_lea.hbm %s2114_s1, 64 }
  0x10   : > { %s2125_s9 = scalar_select %p1711_p10, 1, 0 }
  0x11   : > { %s195_s11 = sshll.u32 %s1585_s10, 4  ;;  %p1374_p11 = pneg %p1711_p10  ;;  %s196_s11 = int_to_ptr.vmem [resolvable:$true] %s195_s11 }
  0x12   : > { %p1490_p13 = scmp.ne.s32.totalorder %s2114_s1, %s1489_s15  ;;  %p1496_p3 = scmp.lt.u32.totalorder %s1489_s15, %s2114_s1 }
  0x13   : > { %p1719_p12 = pnand %p2120_p9, %p1374_p11 }
  0x15   : > { %p1491_p0 = pneg %p1719_p12 }
  0x17   : > { %p1492_p1 = pnand %p1491_p0, %p1490_p13 }
  0x19   : > { %p1493_p2 = pneg %p1492_p1 }
  0x1b   : > { %p1498_p4 = pnand %p1496_p3, %p1493_p2 }
  0x1d   : > { %1501 = shalt.err (!%p1498_p4)
}
  0x1e   : > { %s1502_s20 = scalar_lea.vmem %s196_s11, 64  ;;  %p1510_p9 = scmp.lt.s32.totalorder %s196_s11, %s196_s11 }
  0x1f   : > { %p1503_p7 = scmp.ne.s32.totalorder %s196_s11, %s1502_s20  ;;  %p1511_p6 = scmp.lt.s32.totalorder %s1502_s20, %s1502_s20 }
  0x21   : > { %p1505_p8 = pnand %p1503_p7, %p1491_p0  ;;  %p1512_p5 = por %p1511_p6, %p1510_p9 }
  0x23   : > { %p1506_p11 = pneg %p1505_p8 }
  0x25   : > { %p1513_p10 = pnand %p1512_p5, %p1506_p11 }
  0x27   : > { %1516 = shalt.err (!%p1513_p10)
}
  0x28   : > { %1377 = dma.hbm_to_vmem [thread:$0]  (!%p1719_p12), %s2114_s1, 64, %s196_s11, [#allocation4]  }
  0x29   : > { %p2127_p13 = scmp.ne.s32.totalorder %s2125_s9, 0 }
  0x2a   : > { %p2128_p1 = scmp.eq.s32.totalorder (!%p2127_p13), %s1683_s25, 0 }
  0x2b   : > { %228 = sbr.rel (%p2127_p13) target bundleno = 654 (0x28e), region = 44 }
  0x32   : > { %1562 = dma.done.wait (%p2128_p1), [#allocation4], 64   ;;  %p2129_p0 = pmov %p2128_p1 }
  0x33   : > { %v1586_v0 = vmov 6   ;;  %v1587_v1 = vmov 7   ;;  %p258_p5 = scmp.lt.s32.totalorder %s1683_s25, 1  ;;  %v423_v2 = vld [vmem:[#allocation3] sm:$0xf]  ;;  %v1588_v4 = vmov 0.0   ;;  %v277_v18 = vlaneseq }
  0x34   : > { %1564 = vsyncadd (%p2129_p0), [#allocation4], 4294967232  ;;  %1458 = vset.pattern.permute.xlu0 %v1586_v0  ;;  %1460 = vset.pattern.permute.xlu1 %v1587_v1  ;;  %v1750_v3 = vld [vmem:[#allocation3] sm:$0xf]  ;;  %263 = vst [vmem:[#allocation2] sm:$0xff] %v1588_v4  ;;  %v1589_v7 = vmov 11  }
  0x35   : > { %s259_s29 = scalar_select %p258_p5, %s1683_s25, 1  ;;  %264 = vst [vmem:[#allocation2 + $0x8] sm:$0xff] %v1588_v4  ;;  %441 = vperm.xlu0 %1458, %v423_v2   ;;  %604 = vperm.xlu1 %1460, %v1750_v3   ;;  %v743_v6 = vld [vmem:[#allocation3] sm:$0xf]  ;;  %v1590_v8 = vmov 8   ;;  %v1591_v9 = vmov 16  }
  0x36   : > { %v1592_v10 = vmov 12   ;;  %v1757_v11 = vld [vmem:[#allocation3] sm:$0xf]  ;;  %v1593_v12 = vmov 9   ;;  %v1594_v13 = vmov 17   ;;  %v1595_v14 = vmov 21  }
  0x37   : > { %s1366_s10 = sshll.u32 %s259_s29, 3  ;;  %v1596_v15 = vmov 18   ;;  %v1597_v16 = vmov 13   ;;  %v1598_v17 = vmov 19   ;;  %v1599_v19 = vmov 22   ;;  %s1606_s17 = smov 96  }
  0x38   : > { %s262_s9 = scalar_lea.vmem %s2113_s0, %s1366_s10  ;;  %v1600_v20 = vmov 1   ;;  %v1764_v21 = vshrl.u32 %v277_v18, 7  ;;  %v1358_v22 = vld [vmem:[%s2118_s5 + $0x2] ss:$8 sm:$0x3]  ;;  %v1601_v23 = vmov 14  }
  0x39   : > { %v1753_v5 = vld [vmem:[%s262_s9] sm:$0xff]  ;;  %1459 = vset.pattern.permute.xlu0 %v1589_v7  ;;  %1461 = vset.pattern.permute.xlu1 %v1590_v8  ;;  %v1602_v24 = vmov 3   ;;  %v1603_v30 = vmov 23   ;;  %v1782_v31 = vld [vmem:[#allocation3] sm:$0xf]  ;;  %v1604_v32 = vmov 20  }
  0x3a   : > { %266 = vst [vmem:[#allocation2 + $0x4] sm:$0xff] %v1753_v5  ;;  %468 = vperm.xlu0 %1459, %v423_v2   ;;  %761 = vperm.xlu1 %1461, %v743_v6   ;;  %v1771_v25 = vsub.s32 0, %v1764_v21  ;;  %v1774_v26 = vsub.s32 1, %v1764_v21  ;;  %v1359_v29 = vld [vmem:[%s2118_s5 + $0x3] ss:$8 sm:$0x3] }
  0x3b   : > { %v1605_v36 = vmov 24   ;;  %s1607_s18 = smov 97   ;;  %v1608_v38 = vmov 5   ;;  %v1609_v39 = vmov 10   ;;  %v1610_v40 = vmov 2   ;;  %s1614_s26 = smov 95  }
  0x3c   : > { %v712_v27 = vrot.slane %v1358_v22, %v1771_v25  ;;  %v716_v28 = vrot.slane %v1358_v22, %v1774_v26  ;;  %v873_v34 = vrot.slane %v1359_v29, %v1771_v25  ;;  %v877_v35 = vrot.slane %v1359_v29, %v1774_v26  ;;  %v1357_v41 = vld [vmem:[%s2118_s5 + $0x1] ss:$8 sm:$0x3]  ;;  %s1616_s28 = smov 112   ;;  %s1617_s29 = smov 80  }
  0x3d   : > { %v1611_v42 = vmov 15   ;;  %v554_v43 = vrot.slane %v1357_v41, %v1771_v25  ;;  %v558_v44 = vrot.slane %v1357_v41, %v1774_v26  ;;  %v1612_v45 = vmov 4   ;;  %s1618_s10 = smov 64   ;;  %s1619_s9 = smov 98  }
  0x3e   : > { %1462 = vset.pattern.permute.xlu1 %v1591_v9  ;;  %1463 = vset.pattern.permute.xlu0 %v1592_v10  ;;  %v717_v33 = vcombine.low %v712_v27, %v716_v28  ;;  %v878_v37 = vcombine.low %v873_v34, %v877_v35  ;;  %v1613_v46 = vmov 0   ;;  %v1615_v48 = vmov 839922192   ;;  %v495_v27 = vld [vmem:[#allocation2 + $0xc] sm:$0xf]  ;;  %s1620_s15 = smov 94  }
  0x3f   : > { %497 = vperm.xlu1 %1462, %v423_v2   ;;  %632 = vperm.xlu0 %1463, %v1750_v3   ;;  %v559_v47 = vcombine.low %v554_v43, %v558_v44  ;;  %v275_v49 = vunpack.c.l.s4 %v1615_v48  ;;  %vm307_vm0 = vcmask 1043456   ;;  %vm309_vm1 = vcmask 916480   ;;  %s1622_s19 = smov 126   ;;  %s1623_s20 = smov 125  }
  0x40   : > { %vm337_vm2 = vcmask 785408   ;;  %vm365_vm3 = vcmask 654336   ;;  %vm392_vm4 = vcmask 523264   ;;  %vm563_vm5 = vcmask 777216   ;;  %s1625_s11 = smov 34   ;;  %s1367_s16 = sshll.u32 %s1683_s25, 8 }
  0x41   : > { %v276_v50 = vunpack.c.0.s8 %v275_v49  ;;  %v1805_v53 = vld [vmem:[#allocation2] sm:$0xff]  ;;  %v422_v57 = vld [vmem:[#allocation2 + $0x8] sm:$0xf]  ;;  %vm882_vm6 = vcmask 793600   ;;  %vm1044_vm7 = vcmask 801792   ;;  %vm413_vm8 = vcmask 769024  }
  0x42   : > { %v742_v10 = vld [vmem:[#allocation2 + $0x8] sm:$0xf]  ;;  %vm578_vm9 = vcmask 1039360   ;;  %vm735_vm10 = vcmask 1031168   ;;  %vm897_vm11 = vcmask 1022976   ;;  %vm1059_vm12 = vcmask 1014784  }
  0x43   : > { %1464 = vset.pattern.permute.xlu1 %v1593_v12  ;;  %1466 = vset.pattern.permute.xlu0 %v1594_v13  ;;  %v1803_v51 = vsub.s32 %v276_v50, %v1764_v21  ;;  %v653_v50 = vld [vmem:[#allocation2 + $0xc] sm:$0xf]  ;;  %vm1255_vm13 = vcmask 277504   ;;  %p2130_p9 = scmp.ne.s32.totalorder %s2123_s7, 0  ;;  %s1626_s25 = smov [#allocation6]  }
  0x44   : > { %923 = vperm.xlu1 %1464, %v1757_v11   ;;  %655 = vperm.xlu0 %1466, %v1750_v3  }
  0x48   : > { %1465 = vset.pattern.permute.xlu1 %v1595_v14  ;;  %1469 = vset.pattern.permute.xlu0 %v1596_v15 }
  0x49   : > { %523 = vperm.xlu1 %1465, %v423_v2   ;;  %816 = vperm.xlu0 %1469, %v743_v6  }
  0x4d   : > { %1467 = vset.pattern.permute.xlu1 %v1597_v16  ;;  %1472 = vset.pattern.permute.xlu0 %v1598_v17 }
  0x4e   : > { %790 = vperm.xlu1 %1467, %v743_v6   ;;  %978 = vperm.xlu0 %1472, %v1757_v11  }
  0x52   : > { %1468 = vset.pattern.permute.xlu1 %v1599_v19  ;;  %1475 = vset.pattern.permute.xlu0 %v1600_v20 }
  0x53   : > { %681 = vperm.xlu1 %1468, %v1750_v3   ;;  %426 = vperm.xlu0 %1475, %v423_v2   ;;  %v1815_v2 = vld [vmem:[#allocation2 + $0x8] sm:$0xf] }
  0x57   : > { %1470 = vset.pattern.permute.xlu1 %v1601_v23  ;;  %1478 = vset.pattern.permute.xlu0 %v1602_v24  ;;  %v1833_v23 = vld [vmem:[#allocation2 + $0x8] sm:$0xf] }
  0x58   : > { %952 = vperm.xlu1 %1470, %v1757_v11   ;;  %746 = vperm.xlu0 %1478, %v743_v6  }
  0x5c   : > { %1471 = vset.pattern.permute.xlu1 %v1603_v30  ;;  %1481 = vset.pattern.permute.xlu0 %v1604_v32 }
  0x5d   : > { %842 = vperm.xlu1 %1471, %v743_v6   ;;  %373 = vperm.xlu0 %1481, %v1782_v31  }
  0x61   : > { %1473 = vset.pattern.permute.xlu1 %v1605_v36  ;;  %718 = vrot.lane.b32.xlu0 %v717_v33, %s1606_s17 }
  0x62   : > { %1004 = vperm.xlu1 %1473, %v1757_v11   ;;  %1483 = vset.pattern.permute.xlu0 %v1613_v46 }
  0x65   : > { %879 = vrot.lane.b32.xlu0 %v878_v37, %s1607_s18 }
  0x66   : > { %1474 = vset.pattern.permute.xlu1 %v1608_v38 }
  0x67   : > { %287 = vperm.xlu1 %1474, %v1782_v31  }
  0x6b   : > { %1476 = vset.pattern.permute.xlu1 %v1609_v39 }
  0x6c   : > { %316 = vperm.xlu1 %1476, %v1782_v31  }
  0x70   : > { %1477 = vset.pattern.permute.xlu1 %v1610_v40 }
  0x71   : > { %589 = vperm.xlu1 %1477, %v1750_v3  }
  0x75   : > { %1479 = vset.pattern.permute.xlu1 %v1611_v42 }
  0x76   : > { %346 = vperm.xlu1 %1479, %v1782_v31  }
  0x7a   : > { %1480 = vset.pattern.permute.xlu1 %v1612_v45 }
  0x7b   : > { %908 = vperm.xlu1 %1480, %v1757_v11  }
  0x7f   : > { %560 = vrot.lane.b32.xlu1 %v559_v47, %s1614_s26  ;;  %s1624_s26 = smov 124  }
  0x80   : > { %1482 = vset.pattern.permute.xlu1 %v1613_v46 }
  0xb4   : > { %v442_v52 = vpop.permute.xlu0 %441  ;;  %v605_v54 = vpop.permute.xlu1 %604 }
  0xb5   : > { %v449_v55 = vrot.slane %v442_v52, %v1803_v51  ;;  %v612_v63 = vrot.slane %v605_v54, %v1803_v51 }
  0xb7   : > { %v451_v56 = vmul.f32 %v449_v55, %v1805_v53  ;;  %v452_v61 = vmul.f32 %v449_v55, %v422_v57  ;;  %v614_v3 = vmul.f32 %v612_v63, %v1805_v53  ;;  %v615_v8 = vmul.f32 %v612_v63, %v1815_v2 }
  0xb9   : > { %v469_v58 = vpop.permute.xlu0 %468  ;;  %455 = vrot.lane.b32.xlu1 %v451_v56, %s1616_s28  ;;  %v762_v59 = vpop.permute.xlu1 %761 }
  0xba   : > { %v476_v60 = vrot.slane %v469_v58, %v1803_v51  ;;  %v769_v4 = vrot.slane %v762_v59, %v1803_v51 }
  0xbc   : > { %v478_v62 = vmul.f32 %v476_v60, %v1805_v53  ;;  %v479_v0 = vmul.f32 %v476_v60, %v422_v57  ;;  %v771_v11 = vmul.f32 %v769_v4, %v1805_v53  ;;  %v772_v16 = vmul.f32 %v769_v4, %v742_v10 }
  0xbd   : > { %457 = vrot.lane.b32.xlu1 %v452_v61, %s1616_s28 }
  0xbe   : > { %482 = vrot.lane.b32.xlu0 %v478_v62, %s1606_s17  ;;  %v498_v1 = vpop.permute.xlu1 %497  ;;  %v633_v7 = vpop.permute.xlu0 %632 }
  0xbf   : > { %v505_v6 = vrot.slane %v498_v1, %v1803_v51  ;;  %v640_v12 = vrot.slane %v633_v7, %v1803_v51 }
  0xc1   : > { %484 = vrot.lane.b32.xlu1 %v479_v0, %s1606_s17  ;;  %v507_v13 = vmul.f32 %v505_v6, %v1753_v5  ;;  %v642_v18 = vmul.f32 %v640_v12, %v1753_v5  ;;  %v508_v34 = vmul.f32 %v505_v6, %v495_v27  ;;  %v1360_v12 = vld [vmem:[%s2118_s5 + $0x4] ss:$8 sm:$0x3] }
  0xc2   : > { %618 = vrot.lane.b32.xlu0 %v614_v3, %s1616_s28 }
  0xc3   : > { %v924_v9 = vpop.permute.xlu1 %923  ;;  %v656_v15 = vpop.permute.xlu0 %655 }
  0xc4   : > { %v931_v14 = vrot.slane %v924_v9, %v1803_v51  ;;  %v663_v29 = vrot.slane %v656_v15, %v1803_v51  ;;  %v1035_v15 = vrot.slane %v1360_v12, %v1771_v25 }
  0xc5   : > { %620 = vrot.lane.b32.xlu1 %v615_v8, %s1616_s28  ;;  %v950_v8 = vld [vmem:[#allocation2 + $0xc] sm:$0xf] }
  0xc6   : > { %775 = vrot.lane.b32.xlu0 %v771_v11, %s1616_s28  ;;  %v933_v19 = vmul.f32 %v931_v14, %v1805_v53  ;;  %v934_v32 = vmul.f32 %v931_v14, %v1833_v23  ;;  %v665_v36 = vmul.f32 %v663_v29, %v1753_v5  ;;  %v666_v56 = vmul.f32 %v663_v29, %v653_v50 }
  0xc8   : > { %v524_v17 = vpop.permute.xlu1 %523  ;;  %v817_v22 = vpop.permute.xlu0 %816 }
  0xc9   : > { %777 = vrot.lane.b32.xlu1 %v772_v16, %s1616_s28  ;;  %v531_v33 = vrot.slane %v524_v17, %v1803_v51  ;;  %v824_v54 = vrot.slane %v817_v22, %v1803_v51  ;;  %v1039_v16 = vrot.slane %v1360_v12, %v1774_v26 }
  0xca   : > { %511 = vrot.lane.b32.xlu0 %v507_v13, %s1617_s29 }
  0xcb   : > { %v533_v39 = vmul.f32 %v531_v33, %v1753_v5  ;;  %v534_v47 = vmul.f32 %v531_v33, %v495_v27  ;;  %v826_v58 = vmul.f32 %v824_v54, %v1753_v5  ;;  %v1040_v27 = vcombine.low %v1035_v15, %v1039_v16 }
  0xcd   : > { %644 = vrot.lane.b32.xlu1 %v642_v18, %s1606_s17  ;;  %v791_v28 = vpop.permute.xlu1 %790  ;;  %v979_v30 = vpop.permute.xlu0 %978 }
  0xce   : > { %937 = vrot.lane.b32.xlu0 %v933_v19, %s1616_s28  ;;  %v798_v35 = vrot.slane %v791_v28, %v1803_v51  ;;  %v986_v4 = vrot.slane %v979_v30, %v1803_v51 }
  0xd0   : > { %v800_v42 = vmul.f32 %v798_v35, %v1753_v5  ;;  %v988_v9 = vmul.f32 %v986_v4, %v1753_v5  ;;  %v989_v19 = vmul.f32 %v986_v4, %v950_v8 }
  0xd1   : > { %939 = vrot.lane.b32.xlu1 %v934_v32, %s1616_s28 }
  0xd2   : > { %513 = vrot.lane.b32.xlu0 %v508_v34, %s1617_s29  ;;  %v682_v37 = vpop.permute.xlu1 %681  ;;  %v427_v38 = vpop.permute.xlu0 %426 }
  0xd3   : > { %v1846_v41 = vrot.slane %v427_v38, %v1803_v51  ;;  %v689_v43 = vrot.slane %v682_v37, %v1803_v51 }
  0xd5   : > { %537 = vrot.lane.b32.xlu1 %v533_v39, %s1618_s10  ;;  %v1852_v44 = vmul.f32 %v1846_v41, %v422_v57  ;;  %v691_v52 = vmul.f32 %v689_v43, %v1753_v5  ;;  %v788_v57 = vld [vmem:[#allocation2 + $0xc] sm:$0xf]  ;;  %v692_v1 = vmul.f32 %v689_v43, %v653_v50  ;;  %v399_v43 = vld [vmem:[%s2118_s5] ss:$8 sm:$0x3] }
  0xd6   : > { %669 = vrot.lane.b32.xlu0 %v665_v36, %s1617_s29  ;;  %v801_v61 = vmul.f32 %v798_v35, %v788_v57  ;;  %v827_v7 = vmul.f32 %v824_v54, %v788_v57  ;;  %v1903_v35 = vld [vmem:[#allocation2 + $0x8] sm:$0xf]  ;;  %v408_v50 = vrot.slane %v399_v43, %v1774_v26 }
  0xd7   : > { %v747_v45 = vpop.permute.xlu0 %746  ;;  %v953_v48 = vpop.permute.xlu1 %952 }
  0xd8   : > { %v1856_v49 = vrot.slane %v747_v45, %v1803_v51  ;;  %v960_v59 = vrot.slane %v953_v48, %v1803_v51 }
  0xd9   : > { %804 = vrot.lane.b32.xlu1 %v800_v42, %s1606_s17 }
  0xda   : > { %539 = vrot.lane.b32.xlu0 %v534_v47, %s1618_s10  ;;  %v1863_v55 = vmul.f32 %v1856_v49, %v742_v10  ;;  %v962_v62 = vmul.f32 %v960_v59, %v1753_v5  ;;  %v963_v11 = vmul.f32 %v960_v59, %v950_v8  ;;  %v344_v47 = vld [vmem:[#allocation2 + $0xc] sm:$0xf] }
  0xdc   : > { %v843_v60 = vpop.permute.xlu1 %842  ;;  %v374_v37 = vpop.permute.xlu0 %373 }
  0xdd   : > { %695 = vrot.lane.b32.xlu1 %v691_v52, %s1618_s10  ;;  %v850_v63 = vrot.slane %v843_v60, %v1803_v51  ;;  %v381_v42 = vrot.slane %v374_v37, %v1803_v51 }
  0xde   : > { %671 = vrot.lane.b32.xlu0 %v666_v56, %s1617_s29 }
  0xdf   : > { %v852_v3 = vmul.f32 %v850_v63, %v1753_v5  ;;  %v853_v17 = vmul.f32 %v850_v63, %v788_v57  ;;  %v383_v48 = vmul.f32 %v381_v42, %v1753_v5  ;;  %v384_v56 = vmul.f32 %v381_v42, %v344_v47 }
  0xe1   : > { %830 = vrot.lane.b32.xlu1 %v826_v58, %s1617_s29  ;;  %v1005_v0 = vpop.permute.xlu1 %1004  ;;  %v1932_v58 = vpop.permute.xlu0 %718 }
  0xe2   : > { %806 = vrot.lane.b32.xlu0 %v801_v61, %s1606_s17  ;;  %v1012_v10 = vrot.slane %v1005_v0, %v1803_v51 }
  0xe4   : > { %v1014_v14 = vmul.f32 %v1012_v10, %v1753_v5  ;;  %v1015_v30 = vmul.f32 %v1012_v10, %v950_v8 }
  0xe5   : > { %697 = vrot.lane.b32.xlu1 %v692_v1, %s1618_s10  ;;  %v1936_v60 = vpop.permute.xlu0 %879 }
  0xe6   : > { %966 = vrot.lane.b32.xlu0 %v962_v62, %s1606_s17  ;;  %v288_v6 = vpop.permute.xlu1 %287 }
  0xe7   : > { %v295_v28 = vrot.slane %v288_v6, %v1803_v51 }
  0xe9   : > { %832 = vrot.lane.b32.xlu1 %v827_v7, %s1617_s29  ;;  %v297_v32 = vmul.f32 %v1805_v53, %v295_v28  ;;  %v298_v38 = vmul.f32 %v295_v28, %v1903_v35 }
  0xea   : > { %856 = vrot.lane.b32.xlu0 %v852_v3, %s1618_s10 }
  0xeb   : > { %v317_v13 = vpop.permute.xlu1 %316 }
  0xec   : > { %v324_v33 = vrot.slane %v317_v13, %v1803_v51 }
  0xed   : > { %968 = vrot.lane.b32.xlu1 %v963_v11, %s1606_s17 }
  0xee   : > { %992 = vrot.lane.b32.xlu0 %v988_v9, %s1617_s29  ;;  %v326_v36 = vmul.f32 %v1805_v53, %v324_v33  ;;  %v327_v45 = vmul.f32 %v324_v33, %v1903_v35 }
  0xf0   : > { %v590_v18 = vpop.permute.xlu1 %589 }
  0xf1   : > { %858 = vrot.lane.b32.xlu1 %v853_v17, %s1618_s10  ;;  %v1891_v22 = vrot.slane %v590_v18, %v1803_v51  ;;  %v436_v17 = vmul.f32 %v1846_v41, %v1805_v53 }
  0xf2   : > { %1018 = vrot.lane.b32.xlu0 %v1014_v14, %s1618_s10 }
  0xf3   : > { %v1897_v29 = vmul.f32 %v1891_v22, %v1815_v2 }
  0xf5   : > { %994 = vrot.lane.b32.xlu1 %v989_v19, %s1617_s29  ;;  %v347_v34 = vpop.permute.xlu1 %346 }
  0xf6   : > { %1041 = vrot.lane.b32.xlu0 %v1040_v27, %s1619_s9  ;;  %v354_v2 = vrot.slane %v347_v34, %v1803_v51  ;;  %s255_s9 = sand.u32 1, %s1575_s22  }
  0xf7   : > { %s1354_s13 = sshll.u32 %s255_s9, 4 }
  0xf8   : > { %v356_v39 = vmul.f32 %v354_v2, %v1753_v5  ;;  %v357_v52 = vmul.f32 %v354_v2, %v344_v47  ;;  %v1065_v5 = vld [vmem:[%s2115_s2] sm:$0xf]  ;;  %s257_s14 = scalar_lea.vmem [#allocation6], %s1354_s13 }
  0xf9   : > { %1020 = vrot.lane.b32.xlu1 %v1015_v30, %s1618_s10 }
  0xfa   : > { %301 = vrot.lane.b32.xlu0 %v297_v32, %s1616_s28  ;;  %v1930_v57 = vpop.permute.xlu1 %908 }
  0xfd   : > { %272 = vperm.xlu1 %1482, %v1782_v31   ;;  %v404_v31 = vrot.slane %v399_v43, %v1771_v25 }
  0xfe   : > { %330 = vrot.lane.b32.xlu0 %v326_v36, %s1606_s17  ;;  %v1934_v59 = vpop.permute.xlu1 %560 }
  0xff   : > { %v409_v54 = vcombine.low %v404_v31, %v408_v50  ;;  %v562_v41 = vrot.slane %v1934_v59, 4 }
 0x101   : > { %303 = vrot.lane.b32.xlu1 %v298_v38, %s1616_s28  ;;  %s1521_s28 = sshll.u32 %s1626_s25, 4  ;;  %s1522_s28 = int_to_ptr.vmem [resolvable:$false] %s1521_s28 }
 0x102   : > { %360 = vrot.lane.b32.xlu0 %v356_v39, %s1617_s29 }
 0x105   : > { %332 = vrot.lane.b32.xlu1 %v327_v45, %s1606_s17  ;;  %s1621_s17 = smov 127  }
 0x106   : > { %387 = vrot.lane.b32.xlu0 %v383_v48, %s1618_s10 }
 0x109   : > { %362 = vrot.lane.b32.xlu1 %v357_v52, %s1617_s29  ;;  %v599_v52 = vmul.f32 %v1891_v22, %v1805_v53  ;;  %v720_v22 = vrot.slane %v1932_v58, 4  ;;  %s1523_s29 = scalar_lea.vmem %s1522_s28, 512 }
 0x10a   : > { %410 = vrot.lane.b32.xlu0 %v409_v54, %s1620_s15  ;;  %s1277_s15 = sshll.u32 %s257_s14, 4  ;;  %s2073_s15 = int_to_ptr.vmem [resolvable:$true] %s1277_s15 }
 0x10b   : > { %p1524_p2 = scmp.lt.s32.totalorder %s2073_s15, %s1522_s28 }
 0x10d   : > { %389 = vrot.lane.b32.xlu1 %v384_v56, %s1618_s10 }
 0x111   : > { %1068 = vperm.xlu1 %1482, %v1065_v5  }
 0x115   : > { %1484 = vset.pattern.permute.xlu1 %v1600_v20 }
 0x12b   : > { %v456_v61 = vpop.permute.xlu1 %455 }
 0x12c   : > { %v459_v8 = vrot.slane %v456_v61, 4 }
 0x12f   : > { %v458_v62 = vpop.permute.xlu1 %457 }
 0x130   : > { %v483_v63 = vpop.permute.xlu0 %482  ;;  %v460_v6 = vrot.slane %v458_v62, 4  ;;  %v466_v37 = vadd.f32 %v458_v62, %v1852_v44  ;;  %v564_v44 = vsel %vm563_vm5, %v562_v41, %v1934_v59 }
 0x131   : > { %v486_v9 = vrot.slane %v483_v63, 4 }
 0x132   : > { %v461_v11 = vsel %vm307_vm0, %v459_v8, %v460_v6 }
 0x133   : > { %v485_v0 = vpop.permute.xlu1 %484  ;;  %v462_v15 = vsel %vm309_vm1, %v456_v61, %v461_v11 }
 0x134   : > { %v619_v1 = vpop.permute.xlu0 %618  ;;  %v487_v10 = vrot.slane %v485_v0, 4  ;;  %v465_v32 = vadd.f32 %v462_v15, %v436_v17  ;;  %v493_v47 = vadd.f32 %v485_v0, %v466_v37 }
 0x135   : > { %v622_v30 = vrot.slane %v619_v1, 4 }
 0x136   : > { %v488_v14 = vsel %vm307_vm0, %v486_v9, %v487_v10 }
 0x137   : > { %v1938_v3 = vpop.permute.xlu1 %620  ;;  %v489_v27 = vsel %vm337_vm2, %v483_v63, %v488_v14 }
 0x138   : > { %v1940_v4 = vpop.permute.xlu0 %775  ;;  %v623_v18 = vrot.slane %v1938_v3, 4  ;;  %v492_v36 = vadd.f32 %v489_v27, %v465_v32  ;;  %v629_v17 = vadd.f32 %v1938_v3, %v1897_v29  ;;  %v756_v3 = vmul.f32 %v1856_v49, %v1805_v53 }
 0x139   : > { %v779_v15 = vrot.slane %v1940_v4, 4  ;;  %v881_v49 = vrot.slane %v1936_v60, 4 }
 0x13a   : > { %v624_v34 = vsel %vm307_vm0, %v622_v30, %v623_v18 }
 0x13b   : > { %v1942_v7 = vpop.permute.xlu1 %777  ;;  %v625_v48 = vsel %vm309_vm1, %v619_v1, %v624_v34 }
 0x13c   : > { %v512_v20 = vpop.permute.xlu0 %511  ;;  %v628_v63 = vadd.f32 %v625_v48, %v599_v52  ;;  %v780_v10 = vrot.slane %v1942_v7, 4 }
 0x13d   : > { %v515_v16 = vrot.slane %v512_v20, 4 }
 0x13e   : > { %v781_v30 = vsel %vm307_vm0, %v779_v15, %v780_v10  ;;  %v883_v10 = vsel %vm882_vm6, %v881_v49, %v1936_v60 }
 0x13f   : > { %v1945_v12 = vpop.permute.xlu1 %644  ;;  %v516_v33 = vsel %vm365_vm3, %v515_v16, %v512_v20 }
 0x140   : > { %v1947_v13 = vpop.permute.xlu0 %937  ;;  %v646_v38 = vrot.slane %v1945_v12, 4  ;;  %v520_v43 = vadd.f32 %v516_v33, %v492_v36 }
 0x142   : > { %v647_v5 = vsel %vm337_vm2, %v646_v38, %v1945_v12  ;;  %v651_v34 = vadd.f32 %v646_v38, %v629_v17 }
 0x143   : > { %v1954_v19 = vpop.permute.xlu1 %939  ;;  %v650_v8 = vadd.f32 %v647_v5, %v628_v63  ;;  %v786_v63 = vadd.f32 %v1942_v7, %v1863_v55 }
 0x144   : > { %v514_v28 = vpop.permute.xlu0 %513  ;;  %v942_v38 = vrot.slane %v1954_v19, 4 }
 0x145   : > { %v517_v45 = vsel %vm365_vm3, %v515_v16, %v514_v28  ;;  %v721_v28 = vsel %vm337_vm2, %v720_v22, %v1932_v58 }
 0x146   : > { %v521_v61 = vadd.f32 %v517_v45, %v493_v47 }
 0x147   : > { %v538_v2 = vpop.permute.xlu1 %537 }
 0x148   : > { %v541_v39 = vrot.slane %v538_v2, 4  ;;  %v670_v42 = vpop.permute.xlu0 %669 }
 0x149   : > { %v673_v50 = vrot.slane %v670_v42, 4 }
 0x14a   : > { %v542_v31 = vsel %vm392_vm4, %v541_v39, %v538_v2 }
 0x14b   : > { %v546_v54 = vadd.f32 %v542_v31, %v520_v43  ;;  %v805_v56 = vpop.permute.xlu1 %804  ;;  %v674_v1 = vsel %vm365_vm3, %v673_v50, %v670_v42 }
 0x14c   : > { %v540_v62 = vpop.permute.xlu0 %539  ;;  %v678_v12 = vadd.f32 %v674_v1, %v650_v8  ;;  %v808_v36 = vrot.slane %v805_v56, 4 }
 0x14d   : > { %v543_v0 = vsel %vm392_vm4, %v541_v39, %v540_v62  ;;  %v1971_v6 = vmul.f32 %v564_v44, %v546_v54 }
 0x14e   : > { %v547_v20 = vadd.f32 %v543_v0, %v521_v61  ;;  %v809_v43 = vsel %vm337_vm2, %v808_v36, %v805_v56  ;;  %v916_v56 = vrot.slane %v1930_v57, %v1803_v51 }
 0x14f   : > { %v696_v9 = vpop.permute.xlu1 %695 }
 0x150   : > { %v699_v59 = vrot.slane %v696_v9, 4  ;;  %v672_v11 = vpop.permute.xlu0 %671  ;;  %v568_v14 = vmul.f32 %v562_v41, %v547_v20  ;;  %v782_v41 = vsel %vm309_vm1, %v1940_v4, %v781_v30  ;;  %v941_v4 = vrot.slane %v1947_v13, 4 }
 0x151   : > { %v675_v32 = vsel %vm365_vm3, %v673_v50, %v672_v11  ;;  %v785_v47 = vadd.f32 %v782_v41, %v756_v3 }
 0x152   : > { %v700_v16 = vsel %vm392_vm4, %v699_v59, %v696_v9  ;;  %573 = vrot.lane.b32.xlu0 %v568_v14, %s1621_s17  ;;  %v679_v37 = vadd.f32 %v675_v32, %v651_v34  ;;  %v943_v5 = vsel %vm307_vm0, %v941_v4, %v942_v38  ;;  %v918_v14 = vmul.f32 %v916_v56, %v1805_v53 }
 0x153   : > { %v704_v18 = vadd.f32 %v700_v16, %v678_v12  ;;  %v831_v27 = vpop.permute.xlu1 %830  ;;  %v813_v52 = vadd.f32 %v809_v43, %v785_v47 }
 0x154   : > { %v807_v33 = vpop.permute.xlu0 %806  ;;  %v834_v39 = vrot.slane %v831_v27, 4 }
 0x155   : > { %v1985_v2 = vmul.f32 %v721_v28, %v704_v18  ;;  %v810_v62 = vsel %vm337_vm2, %v808_v36, %v807_v33 }
 0x156   : > { %v835_v48 = vsel %vm365_vm3, %v834_v39, %v831_v27  ;;  %v814_v57 = vadd.f32 %v810_v62, %v786_v63 }
 0x157   : > { %v698_v29 = vpop.permute.xlu1 %697  ;;  %v839_v61 = vadd.f32 %v835_v48, %v813_v52 }
 0x158   : > { %v701_v58 = vsel %vm392_vm4, %v699_v59, %v698_v29  ;;  %v967_v42 = vpop.permute.xlu0 %966  ;;  %v944_v59 = vsel %vm309_vm1, %v1947_v13, %v943_v5  ;;  %v919_v13 = vmul.f32 %v916_v56, %v1833_v23 }
 0x159   : > { %v705_v45 = vadd.f32 %v701_v58, %v679_v37  ;;  %v970_v0 = vrot.slane %v967_v42, 4  ;;  %v947_v16 = vadd.f32 %v944_v59, %v918_v14 }
 0x15b   : > { %v833_v31 = vpop.permute.xlu1 %832  ;;  %v725_v50 = vmul.f32 %v720_v22, %v705_v45  ;;  %v971_v55 = vsel %vm337_vm2, %v970_v0, %v967_v42 }
 0x15c   : > { %v857_v54 = vpop.permute.xlu0 %856  ;;  %v836_v8 = vsel %vm365_vm3, %v834_v39, %v833_v31  ;;  %v975_v30 = vadd.f32 %v971_v55, %v947_v16  ;;  %v948_v39 = vadd.f32 %v1954_v19, %v919_v13  ;;  %v1082_v19 = vld [vmem:[%s2116_s3] sm:$0xff] }
 0x15d   : > { %v860_v44 = vrot.slane %v857_v54, 4  ;;  %730 = vrot.lane.b32.xlu0 %v725_v50, %s1622_s19  ;;  %v840_v7 = vadd.f32 %v836_v8, %v814_v57 }
 0x15f   : > { %v861_v1 = vsel %vm392_vm4, %v860_v44, %v857_v54  ;;  %v969_v20 = vpop.permute.xlu1 %968 }
 0x160   : > { %v865_v9 = vadd.f32 %v861_v1, %v839_v61  ;;  %v993_v22 = vpop.permute.xlu0 %992  ;;  %v972_v36 = vsel %vm337_vm2, %v970_v0, %v969_v20 }
 0x161   : > { %v996_v11 = vrot.slane %v993_v22, 4  ;;  %v976_v42 = vadd.f32 %v972_v36, %v948_v39 }
 0x162   : > { %v886_v12 = vmul.f32 %v883_v10, %v865_v9 }
 0x163   : > { %v859_v15 = vpop.permute.xlu1 %858  ;;  %v997_v60 = vsel %vm365_vm3, %v996_v11, %v993_v22 }
 0x164   : > { %v862_v17 = vsel %vm392_vm4, %v860_v44, %v859_v15  ;;  %v1019_v18 = vpop.permute.xlu0 %1018  ;;  %890 = vrot.lane.b32.xlu0 %v886_v12, %s1623_s20  ;;  %v1001_v41 = vadd.f32 %v997_v60, %v975_v30 }
 0x165   : > { %v866_v27 = vadd.f32 %v862_v17, %v840_v7  ;;  %v1022_v28 = vrot.slane %v1019_v18, 4 }
 0x167   : > { %v1023_v32 = vsel %vm392_vm4, %v1022_v28, %v1019_v18  ;;  %v995_v33 = vpop.permute.xlu1 %994  ;;  %v887_v34 = vmul.f32 %v881_v49, %v866_v27 }
 0x168   : > { %v1042_v37 = vpop.permute.xlu0 %1041  ;;  %v1027_v3 = vadd.f32 %v1023_v32, %v1001_v41  ;;  %v998_v58 = vsel %vm365_vm3, %v996_v11, %v995_v33 }
 0x169   : > { %v1043_v29 = vrot.slane %v1042_v37, 4  ;;  %892 = vrot.lane.b32.xlu1 %v887_v34, %s1623_s20  ;;  %v1002_v47 = vadd.f32 %v998_v58, %v976_v42  ;;  %s1263_s20 = scalar_lea.sflag [#allocation5], %s255_s9 }
 0x16b   : > { %v1045_v43 = vsel %vm1044_vm7, %v1043_v29, %v1042_v37  ;;  %v1021_v45 = vpop.permute.xlu1 %1020 }
 0x16c   : > { %v1048_v23 = vmul.f32 %v1045_v43, %v1027_v3  ;;  %v1024_v38 = vsel %vm392_vm4, %v1022_v28, %v1021_v45  ;;  %v302_v50 = vpop.permute.xlu0 %301 }
 0x16d   : > { %571 = vrot.lane.b32.xlu1 %v1971_v6, %s1621_s17  ;;  %v1028_v48 = vadd.f32 %v1024_v38, %v1002_v47  ;;  %v1234_v6 = vld [vmem:[%s2117_s4] sm:$0xff]  ;;  %v305_v49 = vrot.slane %v302_v50, 4 }
 0x16e   : > { %1052 = vrot.lane.b32.xlu0 %v1048_v23, %s1624_s26 }
 0x16f   : > { %v1049_v31 = vmul.f32 %v1043_v29, %v1028_v48 }
 0x170   : > { %v331_v52 = vpop.permute.xlu0 %330 }
 0x171   : > { %728 = vrot.lane.b32.xlu1 %v1985_v2, %s1622_s19  ;;  %v334_v61 = vrot.slane %v331_v52, 4  ;;  %s2071_s19 = scalar_lea.hbm %s2119_s6, %s1367_s16 }
 0x172   : > { %1085 = vperm.xlu0 %1483, %v1082_v19  }
 0x174   : > { %v361_v56 = vpop.permute.xlu0 %360 }
 0x175   : > { %1054 = vrot.lane.b32.xlu1 %v1049_v31, %s1624_s26  ;;  %v364_v9 = vrot.slane %v361_v56, 4  ;;  %s1517_s26 = scalar_lea.vmem %s2073_s15, 256 }
 0x176   : > { %1486 = vset.pattern.permute.xlu0 %v1602_v24  ;;  %p1518_p6 = scmp.ne.s32.totalorder %s2073_s15, %s1517_s26  ;;  %p1525_p3 = scmp.lt.s32.totalorder %s1523_s29, %s1517_s26 }
 0x177   : > { %1198 = vperm.xlu0 %1486, %v1082_v19  }
 0x178   : > { %v388_v0 = vpop.permute.xlu0 %387  ;;  %p1519_p10 = pnand %p1518_p6, %p2130_p9  ;;  %p1526_p4 = por %p1525_p3, %p1524_p2 }
 0x179   : > { %1124 = vperm.xlu1 %1484, %v1082_v19   ;;  %v391_v11 = vrot.slane %v388_v0, 4 }
 0x17a   : > { %p1520_p12 = pneg %p1519_p10 }
 0x17b   : > { %1488 = vset.pattern.permute.xlu0 %v1613_v46  ;;  %v393_v60 = vsel %vm392_vm4, %v391_v11, %v388_v0  ;;  %v1096_v0 = vsub.s32 4, %v1764_v21 }
 0x17c   : > { %v273_v2 = vpop.permute.xlu1 %272  ;;  %v411_v14 = vpop.permute.xlu0 %410  ;;  %p1527_p7 = pnand %p1526_p4, %p1520_p12 }
 0x17d   : > { %1485 = vset.pattern.permute.xlu1 %v1610_v40  ;;  %v280_v24 = vrot.slane %v273_v2, %v1803_v51  ;;  %v412_v28 = vrot.slane %v411_v14, 4 }
 0x17e   : > { %1161 = vperm.xlu1 %1485, %v1082_v19  }
 0x17f   : > { %v283_v40 = vmul.f32 %v280_v24, %v1903_v35  ;;  %v414_v33 = vsel %vm413_vm8, %v412_v28, %v411_v14 }
 0x180   : > { %v304_v4 = vpop.permute.xlu1 %303 }
 0x181   : > { %v306_v44 = vrot.slane %v304_v4, 4  ;;  %v314_v1 = vadd.f32 %v304_v4, %v283_v40 }
 0x182   : > { %1487 = vset.pattern.permute.xlu1 %v1613_v46  ;;  %v282_v46 = vmul.f32 %v1805_v53, %v280_v24  ;;  %v366_v53 = vsel %vm365_vm3, %v364_v9, %v361_v56 }
 0x183   : > { %1237 = vperm.xlu1 %1487, %v1234_v6   ;;  %v308_v5 = vsel %vm307_vm0, %v305_v49, %v306_v44 }
 0x184   : > { %v333_v54 = vpop.permute.xlu1 %332  ;;  %v310_v20 = vsel %vm309_vm1, %v302_v50, %v308_v5 }
 0x185   : > { %v335_v62 = vrot.slane %v333_v54, 4  ;;  %v313_v22 = vadd.f32 %v310_v20, %v282_v46  ;;  %v342_v57 = vadd.f32 %v333_v54, %v314_v1  ;;  %v1133_v1 = vsub.s32 5, %v1764_v21 }
 0x187   : > { %v336_v8 = vsel %vm307_vm0, %v334_v61, %v335_v62 }
 0x188   : > { %v363_v63 = vpop.permute.xlu1 %362  ;;  %v338_v59 = vsel %vm337_vm2, %v331_v52, %v336_v8 }
 0x189   : > { %v367_v35 = vsel %vm365_vm3, %v364_v9, %v363_v63  ;;  %v341_v12 = vadd.f32 %v338_v59, %v313_v22  ;;  %v1207_v9 = vsub.s32 7, %v1764_v21  ;;  %v1166_v22 = vsub.s32 2, %v1764_v21 }
 0x18a   : > { %v371_v7 = vadd.f32 %v367_v35, %v342_v57 }
 0x18b   : > { %v370_v17 = vadd.f32 %v366_v53, %v341_v12  ;;  %v1170_v12 = vsub.s32 6, %v1764_v21 }
 0x18c   : > { %v390_v10 = vpop.permute.xlu1 %389 }
 0x18d   : > { %v394_v15 = vsel %vm392_vm4, %v391_v11, %v390_v10  ;;  %v397_v13 = vadd.f32 %v393_v60, %v370_v17  ;;  %v1203_v11 = vsub.s32 3, %v1764_v21 }
 0x18e   : > { %v398_v27 = vadd.f32 %v394_v15, %v371_v7 }
 0x18f   : > { %v417_v58 = vmul.f32 %v414_v33, %v397_v13 }
 0x190   : > { %v1069_v55 = vpop.permute.xlu1 %1068  ;;  %v418_v34 = vmul.f32 %v412_v28, %v398_v27 }
 0x191   : > { %v1076_v56 = vrot.slane %v1069_v55, %v1803_v51 }
 0x1c4   : > { %v574_v16 = vpop.permute.xlu0 %573 }
 0x1c5   : > { %v576_v36 = vrot.slane %v574_v16, 4  ;;  %v583_v39 = vadd.f32 %v574_v16, %v418_v34 }
 0x1cf   : > { %v731_v30 = vpop.permute.xlu0 %730 }
 0x1d0   : > { %v733_v45 = vrot.slane %v731_v30, 4  ;;  %v740_v23 = vadd.f32 %v731_v30, %v583_v39 }
 0x1d6   : > { %v891_v37 = vpop.permute.xlu0 %890 }
 0x1d7   : > { %v894_v38 = vrot.slane %v891_v37, 4 }
 0x1db   : > { %v893_v18 = vpop.permute.xlu1 %892 }
 0x1dc   : > { %v895_v29 = vrot.slane %v893_v18, 4  ;;  %v902_v31 = vadd.f32 %v893_v18, %v740_v23 }
 0x1de   : > { %v896_v19 = vsel %vm307_vm0, %v894_v38, %v895_v29 }
 0x1df   : > { %v572_v32 = vpop.permute.xlu1 %571  ;;  %v898_v44 = vsel %vm897_vm11, %v891_v37, %v896_v19 }
 0x1e0   : > { %v575_v41 = vrot.slane %v572_v32, 4  ;;  %v1053_v48 = vpop.permute.xlu0 %1052 }
 0x1e1   : > { %v1056_v52 = vrot.slane %v1053_v48, 4 }
 0x1e2   : > { %v577_v3 = vsel %vm307_vm0, %v575_v41, %v576_v36 }
 0x1e3   : > { %v579_v42 = vsel %vm578_vm9, %v572_v32, %v577_v3  ;;  %v729_v43 = vpop.permute.xlu1 %728 }
 0x1e4   : > { %v732_v47 = vrot.slane %v729_v43, 4  ;;  %v582_v6 = vadd.f32 %v579_v42, %v417_v58 }
 0x1e6   : > { %v734_v2 = vsel %vm307_vm0, %v732_v47, %v733_v45 }
 0x1e7   : > { %v736_v50 = vsel %vm735_vm10, %v729_v43, %v734_v2  ;;  %v1055_v4 = vpop.permute.xlu1 %1054 }
 0x1e8   : > { %v739_v54 = vadd.f32 %v736_v50, %v582_v6  ;;  %v1057_v24 = vrot.slane %v1055_v4, 4  ;;  %v1064_v49 = vadd.f32 %v1055_v4, %v902_v31 }
 0x1ea   : > { %v901_v40 = vadd.f32 %v898_v44, %v739_v54  ;;  %v1058_v5 = vsel %vm307_vm0, %v1056_v52, %v1057_v24  ;;  %v1079_v63 = vadd.f32 %v1076_v56, %v1064_v49 }
 0x1eb   : > { %v1060_v61 = vsel %vm1059_vm12, %v1053_v48, %v1058_v5 }
 0x1ec   : > { %v1063_v62 = vadd.f32 %v1060_v61, %v901_v40  ;;  %v1081_v8 = vmax.f32 %v1079_v63, 0.0 }
 0x1ee   : > { %v1078_v46 = vadd.f32 %v1076_v56, %v1063_v62  ;;  %v1101_v35 = vrot.slane %v1081_v8, %v1771_v25  ;;  %v1138_v14 = vrot.slane %v1081_v8, %v1774_v26  ;;  %v1175_v15 = vrot.slane %v1081_v8, %v1166_v22 }
 0x1ef   : > { %v1212_v21 = vrot.slane %v1081_v8, %v1203_v11 }
 0x1f0   : > { %v1080_v20 = vmax.f32 %v1078_v46, 0.0  ;;  %v1116_v27 = vrot.slane %v1101_v35, %v1771_v25  ;;  %v1153_v30 = vrot.slane %v1138_v14, %v1774_v26  ;;  %v1190_v45 = vrot.slane %v1175_v15, %v1166_v22 }
 0x1f1   : > { %v1086_v55 = vpop.permute.xlu0 %1085  ;;  %v1227_v23 = vrot.slane %v1212_v21, %v1203_v11 }
 0x1f2   : > { %v1093_v10 = vrot.slane %v1080_v20, %v1771_v25  ;;  %v1097_v51 = vrot.slane %v1080_v20, %v1096_v0  ;;  %v1130_v57 = vrot.slane %v1080_v20, %v1774_v26  ;;  %v1134_v59 = vrot.slane %v1080_v20, %v1133_v1 }
 0x1f3   : > { %v1204_v53 = vrot.slane %v1080_v20, %v1203_v11  ;;  %v1208_v7 = vrot.slane %v1080_v20, %v1207_v9  ;;  %v1167_v13 = vrot.slane %v1080_v20, %v1166_v22  ;;  %v1171_v32 = vrot.slane %v1080_v20, %v1170_v12 }
 0x1f4   : > { %v1108_v16 = vrot.slane %v1093_v10, %v1771_v25  ;;  %v1112_v17 = vrot.slane %v1097_v51, %v1771_v25  ;;  %v1145_v18 = vrot.slane %v1130_v57, %v1774_v26  ;;  %v1149_v60 = vrot.slane %v1134_v59, %v1774_v26 }
 0x1f5   : > { %v1219_v39 = vrot.slane %v1204_v53, %v1203_v11  ;;  %v1223_v29 = vrot.slane %v1208_v7, %v1203_v11  ;;  %v1119_v3 = vmul.f32 %v1116_v27, %v1086_v55  ;;  %v1182_v42 = vrot.slane %v1167_v13, %v1166_v22 }
 0x1f6   : > { %v1117_v41 = vmul.f32 %v1108_v16, %v1086_v55  ;;  %v1118_v37 = vmul.f32 %v1112_v17, %v1086_v55  ;;  %v1199_v58 = vpop.permute.xlu0 %1198  ;;  %v1186_v43 = vrot.slane %v1171_v32, %v1166_v22 }
 0x1f7   : > { %v1228_v6 = vmul.f32 %v1219_v39, %v1199_v58  ;;  %v1229_v2 = vmul.f32 %v1223_v29, %v1199_v58  ;;  %v1230_v50 = vmul.f32 %v1227_v23, %v1199_v58 }
 0x1f8   : > { %v1125_v28 = vpop.permute.xlu1 %1124 }
 0x1f9   : > { %v1154_v33 = vmul.f32 %v1145_v18, %v1125_v28  ;;  %v1155_v34 = vmul.f32 %v1149_v60, %v1125_v28  ;;  %v1156_v36 = vmul.f32 %v1153_v30, %v1125_v28 }
 0x1fb   : > { %v1157_v25 = vadd.f32 %v1154_v33, %v1117_v41  ;;  %v1158_v38 = vadd.f32 %v1155_v34, %v1118_v37  ;;  %v1159_v26 = vadd.f32 %v1156_v36, %v1119_v3 }
 0x1fd   : > { %v1162_v47 = vpop.permute.xlu1 %1161 }
 0x1fe   : > { %v1191_v48 = vmul.f32 %v1182_v42, %v1162_v47  ;;  %v1192_v19 = vmul.f32 %v1186_v43, %v1162_v47  ;;  %v1193_v31 = vmul.f32 %v1190_v45, %v1162_v47 }
 0x200   : > { %v1194_v4 = vadd.f32 %v1191_v48, %v1157_v25  ;;  %v1195_v52 = vadd.f32 %v1192_v19, %v1158_v38  ;;  %v1196_v54 = vadd.f32 %v1193_v31, %v1159_v26 }
 0x202   : > { %v1238_v24 = vpop.permute.xlu1 %1237  ;;  %v1231_v49 = vadd.f32 %v1228_v6, %v1194_v4  ;;  %v1232_v44 = vadd.f32 %v1229_v2, %v1195_v52  ;;  %v1233_v56 = vadd.f32 %v1230_v50, %v1196_v54 }
 0x204   : > { %v1240_v40 = vadd.f32 %v1238_v24, %v1231_v49  ;;  %v1241_v5 = vadd.f32 %v1238_v24, %v1232_v44  ;;  %v1242_v61 = vadd.f32 %v1238_v24, %v1233_v56 }
 0x206   : > { %v1244_v62 = vmax.f32 %v1241_v5, 0.0  ;;  %v1243_v63 = vmax.f32 %v1240_v40, 0.0  ;;  %v1245_v46 = vmax.f32 %v1242_v61, 0.0 }
 0x208   : > { %1251 = vrot.lane.b32.xlu0 %v1244_v62, %s1625_s11  ;;  %1249 = vrot.lane.b32.xlu1 %v1243_v63, %s1625_s11 }
 0x20c   : > { %1253 = vrot.lane.b32.xlu1 %v1245_v46, %s1625_s11 }
 0x27a   : > { %v1252_v0 = vpop.permute.xlu0 %1251  ;;  %v1250_v1 = vpop.permute.xlu1 %1249 }
 0x27b   : > { %v1256_v20 = vsel %vm1255_vm13, %v1250_v1, %v1252_v0 }
 0x27c   : > { %1260 = vst [vmem:[%s257_s14] sm:$0xff] %v1256_v20 }
 0x27e   : > { %v1254_v8 = vpop.permute.xlu1 %1253 }
 0x27f   : > { %v1257_v9 = vsel %vm1255_vm13, %v1252_v0, %v1254_v8 }
 0x280   : > { %1261 = vst [vmem:[%s257_s14 + $0x8] sm:$0xff] %v1257_v9 }
 0x281   : > { %1530 = shalt.err (!%p1527_p7)
}
 0x282   : > { %s1531_s10 = scalar_lea.hbm %s2071_s19, 256  ;;  %s1535_s9 = scalar_lea.hbm %s2119_s6, 512 }
 0x283   : > { %p1532_p8 = scmp.ne.s32.totalorder %s2071_s19, %s1531_s10  ;;  %p1536_p1 = scmp.lt.u32.totalorder %s2071_s19, %s2119_s6 }
 0x284   : > { %p1537_p0 = scmp.lt.u32.totalorder %s1535_s9, %s1531_s10  ;;  %p1539_p6 = scmp.lt.u32.totalorder %s1531_s10, %s2071_s19 }
 0x285   : > { %p1533_p11 = pnand %p1532_p8, %p2130_p9 }
 0x286   : > { %p1538_p5 = por %p1537_p0, %p1536_p1 }
 0x287   : > { %p1534_p13 = pneg %p1533_p11 }
 0x288   : > { %p1540_p10 = por %p1539_p6, %p1538_p5 }
 0x28a   : > { %p1541_p12 = pnand %p1540_p10, %p1534_p13 }
 0x28c   : > { %1544 = shalt.err (!%p1541_p12)
}
 0x28d   : > { %1372 = dma.vmem_to_hbm [thread:$0]  (%p2130_p9), %s2073_s15, 256, %s2071_s19, %s1263_s20  }
 0x28e PF: > { %p1384_p2 = scmp.ge.s32.totalorder %s1583_s24, 2  ;;  %s1289_s16 = sand.u32 1, %s1571_s21  }
 0x28f   : > { %p2131_p3 = scmp.ne.s32.totalorder %s2124_s8, 0  ;;  %s1290_s18 = scalar_lea.sflag [#allocation5], %s1289_s16 }
 0x291   : > { %p1379_p4 = pnand %p1384_p2, %p2131_p3 }
 0x293   : > { %1566 = dma.done.wait (!%p1379_p4), %s1290_s18, 256  }
 0x294   : > { %1568 = vsyncadd (!%p1379_p4), %s1290_s18, 4294967040  ;;  %p17_p7 = scmp.ge.s32.totalorder %s1687_s27, 4   ;;  %s2132_s21 = smov %s1575_s22 }
 0x295   : > { %s2133_s22 = smov %s1579_s23  ;;  %s2134_s23 = smov %s1698_s30 }
 0x296   : > { %s2135_s24 = smov %s1687_s27  ;;  %19 = sbr.rel (!%p17_p7) target bundleno = 4 (0x4), region = 88 }
 0x29d   :  { %1295 = vsyncpa [#allocation4], 1 }
 0x29e   :  { %1297 = vsyncpa [#allocation4 + $0x1], 1 }
 0x29f   :  { %1298 = vsyncpa [#allocation5], 1 }
 0x2a0   :  { %1300 = vsyncpa [#allocation5 + $0x1], 1 }

</bundles_post_ra>
